<compile_context>
chip_gen: v5e
topology: v5e:2x2
jax: 0.10.0
libtpu: 0.0.40
codegen_flags: <defaults>
</compile_context>

<pallas_src>
import functools

import jax
import jax.numpy as jnp
from jax.experimental import pallas as pl
from jax.experimental.pallas import tpu as pltpu


# ---------------------------------------------------------------------------
# Kernel
# ---------------------------------------------------------------------------
def _dino_loss_kernel(tt_ref, student_ref, teacher_ref, center_ref, out_ref,
                      *, student_temperature):
    G, tb, D = teacher_ref.shape                    # num_global_views, tile, dim
    A = student_ref.shape[0]                        # num_augs
    f32 = jnp.float32

    ones_d = jnp.ones((D, 1), f32)                  # lane-sum operand for the MXU

    teacher = teacher_ref[...].astype(f32)          # (G, tb, D)
    center = center_ref[...].astype(f32)            # (1, D) -> broadcasts
    inv_tt = 1.0 / tt_ref[0, 0]                     # single scalar divide (SMEM)

    # ---- per-tile teacher feature sum (for the momentum center update) -----
    if G * tb >= 512:
        # Large tiles: fold the cross-sublane reduction onto the (otherwise
        # idle) MXU instead of a tb/8-vreg XLU reduce tree.
        csum = jnp.dot(jnp.ones((1, G * tb), f32), teacher.reshape(G * tb, D),
                       preferred_element_type=f32)                 # (1, D)
    else:
        csum = jnp.sum(teacher, axis=(0, 1))[None, :]              # (1, D)

    # ---- teacher softmax((t - center) / teacher_temp, axis=-1) -------------
    t_logits = (teacher - center) * inv_tt
    t_max = jnp.max(t_logits, axis=-1, keepdims=True)              # XLU max
    t_exp = jnp.exp(t_logits - t_max)                              # EUP exp
    t_den = jnp.dot(t_exp.reshape(G * tb, D), ones_d,              # MXU lane-sum
                    preferred_element_type=f32).reshape(G, tb, 1)
    t_soft = t_exp * pl.reciprocal(t_den, approx=True)             # EUP vrcp
    t_sum = jnp.sum(t_soft, axis=0)                                # (tb, D), G VPU adds

    # ---- student log-softmax, one view at a time ----------------------------
    # Only one (tb, D) f32 slab is live per iteration plus the running
    # accumulators; the full (A, tb, D) temporaries never materialize.
    inv_st = f32(1.0 / student_temperature)
    s_sum = jnp.zeros((tb, D), f32)                 # running sum_a log_softmax
    diag = f32(0.0)                                 # running sum_g <t_g, ls_g>
    for a in range(A):                              # static unroll, A is small
        s = student_ref[a].astype(f32) * inv_st                     # (tb, D)
        s_shift = s - jnp.max(s, axis=-1, keepdims=True)            # XLU max
        s_lse = jnp.log(jnp.dot(jnp.exp(s_shift), ones_d,           # MXU lane-sum
                                preferred_element_type=f32))        # (tb, 1)
        ls = s_shift - s_lse
        s_sum = s_sum + ls
        if a < G:
            # Reference mask drops exactly the (g, g) pairs; the first G
            # student views are the teacher's global views, in the same order.
            diag = diag + jnp.sum(jnp.dot(t_soft[a] * ls, ones_d,
                                          preferred_element_type=f32))

    # sum_{g, a != g} <t_g, ls_a> = <sum_g t_g, sum_a ls_a> - sum_g <t_g, ls_g>
    main = jnp.sum(jnp.dot(t_sum * s_sum, ones_d, preferred_element_type=f32))
    loss_partial = diag - main                       # per-tile partial of -sum

    # Single lane-dense output block per tile:
    #   row 0 = teacher feature sum, row 1 = loss partial (broadcast to lanes).
    out_ref[...] = jnp.concatenate(
        [csum, jnp.broadcast_to(loss_partial, (1, D))], axis=0)[None]


# ---------------------------------------------------------------------------
# Hardware query + tile chooser
# ---------------------------------------------------------------------------
def _tpu_vmem_and_cores():
    """Best-effort (VMEM capacity, TensorCores per chip). Falls back to the
    most conservative values (v7x-sized VMEM, 1 core) if the query fails."""
    try:
        info = pltpu.get_tpu_info()
    except Exception:
        info = None
    vmem = getattr(info, "vmem_capacity_bytes", None) if info is not None else None
    if not vmem:
        vmem = 64 << 20                      # v7x per-TC size: safe everywhere
    cores = 1
    if info is not None:
        for name in ("num_cores", "core_count", "num_tensorcores",
                     "tensor_cores_per_chip", "num_tensor_cores"):
            v = getattr(info, name, None)
            if isinstance(v, int) and v > 0:
                cores = v
                break
    return int(vmem), int(cores)


def _choose_batch_tile(batch, feat_dim, num_augs, num_global, itemsize,
                       budget_bytes, num_cores=1):
    """Largest batch tile dividing `batch` (sublane-aligned for the input
    dtype, or equal to `batch`) whose working set fits `budget_bytes`.
    With num_cores > 1 also require the grid to be a multiple of the core
    count so CORE_PARALLEL keeps every TensorCore busy."""
    # Double-buffered native-dtype input blocks + f32 temporaries actually
    # live at once (teacher, t_soft, t_sum, s_sum, one student slab + slack).
    in_row = 2 * (num_augs + num_global) * feat_dim * int(itemsize)
    tmp_row = (2 * num_global + 6) * feat_dim * 4
    per_row = in_row + tmp_row

    align = (8 * 4) // max(int(itemsize), 1)      # 8 rows f32, 16 bf16, 32 int8
    candidates = sorted({tb for tb in range(align, batch, align)
                         if batch % tb == 0} | {batch})

    def ok(tb):
        if per_row * tb > budget_bytes:
            return False
        if num_cores > 1 and (batch // tb) % num_cores != 0:
            return False
        return True

    fitting = [tb for tb in candidates if ok(tb)]
    if fitting:
        return max(fitting)
    # Nothing satisfies every constraint (tiny / oddly-sized batch): smallest
    # candidate; the wrapper raises vmem_limit_bytes so this still compiles.
    return min(candidates)


# ---------------------------------------------------------------------------
# Module wrapper
# ---------------------------------------------------------------------------
class DINOLossPallas:
    """JAX/Pallas port of orthrus.losses.DINOLoss (forward + center update)."""

    def __init__(self, representation_dim: int = 128,
                 student_temperature: float = 0.1,
                 warmup_teacher_temperature: float = 0.04,
                 warmup_teacher_temperature_epochs: int = 30,
                 teacher_temperature: float = 0.04,
                 center_momentum: float = 0.9,
                 num_local_views: int = 8,
                 num_global_views: int = 2,
                 total_epochs: int = 300):
        self.student_temperature = student_temperature
        self.center_momentum = center_momentum
        self.num_augs = num_local_views * num_global_views + num_global_views
        self.num_global_views = num_global_views
        self.center = jnp.zeros((1, representation_dim), jnp.float32)
        warm = jnp.linspace(warmup_teacher_temperature, teacher_temperature,
                            warmup_teacher_temperature_epochs)
        rest = jnp.full((total_epochs - warmup_teacher_temperature_epochs,),
                        teacher_temperature, dtype=jnp.float32)
        self.teacher_temperature_schedule = jnp.concatenate(
            [warm.astype(jnp.float32), rest])

    def __call__(self, student_output, teacher_output, epoch: int):
        G, A = self.num_global_views, self.num_augs
        assert teacher_output.shape[0] % G == 0
        B = teacher_output.shape[0] // G
        D = teacher_output.shape[-1]
        assert student_output.shape == (A * B, D)
        # Implicit layout contract (mirrors the reference mask[i, i] = False):
        # the first G student views are the teacher's global views, same order.

        tt = self.teacher_temperature_schedule[epoch].reshape(1, 1)
        tt = tt.astype(jnp.float32)

        # Native dtype straight into the kernel (bf16 halves HBM->VMEM bytes).
        student3 = student_output.reshape(A, B, D)
        teacher3 = teacher_output.reshape(G, B, D)

        vmem_cap, num_cores = _tpu_vmem_and_cores()
        budget = int(0.6 * vmem_cap)     # ~76 MiB on 128-MiB chips, ~38 MiB v7x
        tile_b = _choose_batch_tile(B, D, A, G, student3.dtype.itemsize,
                                    budget, num_cores)
        assert B % tile_b == 0
        num_tiles = B // tile_b

        if num_cores > 1 and num_tiles % num_cores == 0 and num_tiles >= num_cores:
            dim_sem = (pltpu.CORE_PARALLEL,)   # shard the batch grid over TCs
        else:
            dim_sem = ("parallel",)

        kernel = functools.partial(
            _dino_loss_kernel,
            student_temperature=float(self.student_temperature))

        in_bytes = (student3.size * student3.dtype.itemsize
                    + teacher3.size * teacher3.dtype.itemsize + D * 4 + 4)
        out_bytes = num_tiles * 2 * D * 4
        cost = pl.CostEstimate(
            flops=int(14 * (A + G) * B * D),
            transcendentals=int((A + G) * B * (D + 2)),
            bytes_accessed=int(in_bytes + out_bytes))

        out = pl.pallas_call(
            kernel,
            grid=(num_tiles,),
            out_shape=jax.ShapeDtypeStruct((num_tiles, 2, D), jnp.float32),
            in_specs=[
                pl.BlockSpec(memory_space=pltpu.MemorySpace.SMEM),   # tt (1,1)
                pl.BlockSpec((A, tile_b, D), lambda i: (0, i, 0)),   # student
                pl.BlockSpec((G, tile_b, D), lambda i: (0, i, 0)),   # teacher
                pl.BlockSpec((1, D), lambda i: (0, 0)),              # center
                # TODO(synk): if a v5e profile still shows exposed DMA, bump
                # the student/teacher specs to pipeline_mode=pl.Buffered(3).
            ],
            out_specs=pl.BlockSpec((1, 2, D), lambda i: (i, 0, 0)),
            compiler_params=pltpu.CompilerParams(
                dimension_semantics=dim_sem,
                vmem_limit_bytes=int(0.85 * vmem_cap)),
            cost_estimate=cost,
        )(tt, student3, teacher3, self.center)

        partial_csum = out[:, 0, :]      # (num_tiles, D)
        partial_loss = out[:, 1, 0]      # (num_tiles,)

        # Tiny final reductions + momentum center update in plain JAX so the
        # batch-tile grid axis never revisits an output block.
        n_kept = (G * A - G) * B
        loss = jnp.sum(partial_loss) / jnp.float32(n_kept)

        batch_center = jnp.sum(partial_csum, axis=0) / jnp.float32(G * B)
        # TODO(synk): torch.distributed all_reduce of batch_center has no
        # single-chip equivalent here; world_size is treated as 1.
        # NOTE: Python-side buffer mutation mirrors nn.Module semantics but is
        # not jit/grad-safe; thread `center` functionally for jitted training.
        self.center = (self.center_momentum * self.center
                       + (1.0 - self.center_momentum) * batch_center[None, :])
        return loss


# ---------------------------------------------------------------------------
# Pure-JAX reference (for the self-test)
# ---------------------------------------------------------------------------
def _reference(student, teacher, center, tt, st, G, A, cm):
    B = teacher.shape[0] // G
    D = teacher.shape[-1]
    t_soft = jax.nn.softmax((teacher.astype(jnp.float32) - center) / tt,
                            axis=-1).reshape(G, B, D)
    s_log = jax.nn.log_softmax(student.astype(jnp.float32) / st,
                               axis=-1).reshape(A, B, D)
    lm = jnp.einsum('gbd,abd->gab', -t_soft, s_log)
    mask = jnp.ones((G, A), bool).at[jnp.arange(G), jnp.arange(G)].set(False)
    loss = jnp.sum(jnp.where(mask[:, :, None], lm, 0.0)) / (mask.sum() * B)
    bc = jnp.sum(teacher.astype(jnp.float32), axis=0, keepdims=True) / teacher.shape[0]
    return loss, cm * center + (1.0 - cm) * bc


if __name__ == "__main__":
    # Small but representative shapes: D=128, per-view batch B=8,
    # num_global_views=2, num_local_views=8 -> num_augs=18.
    D, B = 128, 8
    mod = DINOLossPallas(representation_dim=D)
    G, A = mod.num_global_views, mod.num_augs
    epoch = 5

    key = jax.random.PRNGKey(0)
    k_s, k_t = jax.random.split(key)
    student_output = jax.random.normal(k_s, (A * B, D), dtype=jnp.float32)
    teacher_output = jax.random.normal(k_t, (G * B, D), dtype=jnp.float32)

    center_before = mod.center
    loss = mod(student_output, teacher_output, epoch)
    jax.block_until_ready(loss)
    jax.block_until_ready(mod.center)

    # Pure-JAX correctness check (f32). Tolerance loosened for the approx EUP
    # reciprocal + MXU-accumulated lane sums.
    tt = mod.teacher_temperature_schedule[epoch]
    ref_loss, ref_center = _reference(student_output, teacher_output,
                                      center_before, tt,
                                      mod.student_temperature, G, A,
                                      mod.center_momentum)
    assert jnp.allclose(loss, ref_loss, rtol=5e-3, atol=1e-2), (loss, ref_loss)
    assert jnp.allclose(mod.center, ref_center, rtol=1e-4, atol=1e-5), (
        mod.center, ref_center)

    # bf16 inputs go straight to the kernel (no host-side f32 cast) — smoke test.
    mod_bf16 = DINOLossPallas(representation_dim=D)
    loss_bf16 = mod_bf16(student_output.astype(jnp.bfloat16),
                         teacher_output.astype(jnp.bfloat16), epoch)
    jax.block_until_ready(loss_bf16)
    assert bool(jnp.isfinite(loss_bf16))
    assert jnp.allclose(loss_bf16, ref_loss, rtol=0.1, atol=0.1)

    print("KERNEL_OK")
</pallas_src>

<mosaic_0001>
module attributes {stable_mosaic.version = 11 : i64} {
  func.func @_dino_loss_kernel(%arg0: i32, %arg1: memref<1x1xf32, #tpu.memory_space<smem>>, %arg2: memref<18x8x128xf32, #tpu.memory_space<vmem>>, %arg3: memref<2x8x128xf32, #tpu.memory_space<vmem>>, %arg4: memref<1x128xf32, #tpu.memory_space<vmem>>, %arg5: memref<1x2x128xf32, #tpu.memory_space<vmem>>) attributes {dimension_semantics = [#tpu.dimension_semantics<parallel>], iteration_bounds = array<i64: 1>, scalar_prefetch = 0 : i64, scratch_operands = 0 : i64, tpu.core_type = #tpu.core_type<tc>, window_params = [{transform_indices = @transform_0, window_bounds = array<i64: 1, 1>}, {transform_indices = @transform_1, window_bounds = array<i64: 18, 8, 128>}, {transform_indices = @transform_2, window_bounds = array<i64: 2, 8, 128>}, {pipeline_mode = #tpu.pipeline_mode<synchronous>, transform_indices = @transform_3, window_bounds = array<i64: 1, 128>}, {transform_indices = @transform_4, window_bounds = array<i64: 1, 2, 128>}]} {
    %cst = arith.constant 1.000000e+00 : f32
    %0 = vector.broadcast %cst : f32 to vector<128x1xf32>
    %c0 = arith.constant 0 : index
    %c0_0 = arith.constant 0 : index
    %c0_1 = arith.constant 0 : index
    %1 = vector.load %arg3[%c0, %c0_0, %c0_1] : memref<2x8x128xf32, #tpu.memory_space<vmem>>, vector<2x8x128xf32>
    %c0_2 = arith.constant 0 : index
    %c0_3 = arith.constant 0 : index
    %2 = vector.load %arg4[%c0_2, %c0_3] : memref<1x128xf32, #tpu.memory_space<vmem>>, vector<1x128xf32>
    %c0_4 = arith.constant 0 : index
    %c0_5 = arith.constant 0 : index
    %3 = memref.load %arg1[%c0_4, %c0_5] : memref<1x1xf32, #tpu.memory_space<smem>>
    %cst_6 = arith.constant 1.000000e+00 : f32
    %4 = arith.divf %cst_6, %3 : f32
    %cst_7 = arith.constant dense<0.000000e+00> : vector<128xf32>
    %5 = vector.multi_reduction <add>, %1, %cst_7 [0, 1] : vector<2x8x128xf32> to vector<128xf32>
    %6 = vector.shape_cast %5 : vector<128xf32> to vector<1x128xf32>
    %7 = vector.shape_cast %2 : vector<1x128xf32> to vector<1x1x128xf32>
    %8 = vector.broadcast %7 : vector<1x1x128xf32> to vector<2x8x128xf32>
    %9 = arith.subf %1, %8 : vector<2x8x128xf32>
    %10 = vector.broadcast %4 : f32 to vector<2x8x128xf32>
    %11 = arith.mulf %9, %10 : vector<2x8x128xf32>
    %cst_8 = arith.constant dense<0xFF800000> : vector<2x8xf32>
    %12 = vector.multi_reduction <maximumf>, %11, %cst_8 [2] : vector<2x8x128xf32> to vector<2x8xf32>
    %13 = vector.shape_cast %12 : vector<2x8xf32> to vector<2x8x1xf32>
    %14 = vector.broadcast %13 : vector<2x8x1xf32> to vector<2x8x128xf32>
    %15 = arith.subf %11, %14 : vector<2x8x128xf32>
    %16 = math.exp %15 : vector<2x8x128xf32>
    %17 = vector.shape_cast %16 : vector<2x8x128xf32> to vector<16x128xf32>
    %cst_9 = arith.constant dense<0.000000e+00> : vector<16x1xf32>
    %18 = tpu.matmul %17, %0, %cst_9 {dimension_numbers = #tpu.dot_dimension_numbers<[1], [0], [0], [1], [0, 0, 1, 1], [], []>} : vector<16x128xf32>, vector<128x1xf32>, vector<16x1xf32> -> vector<16x1xf32>
    %19 = vector.shape_cast %18 : vector<16x1xf32> to vector<2x8x1xf32>
    %20 = tpu.reciprocal %19 {approx = true} : vector<2x8x1xf32> -> vector<2x8x1xf32>
    %21 = vector.broadcast %20 : vector<2x8x1xf32> to vector<2x8x128xf32>
    %22 = arith.mulf %16, %21 : vector<2x8x128xf32>
    %cst_10 = arith.constant dense<0.000000e+00> : vector<8x128xf32>
    %23 = vector.multi_reduction <add>, %22, %cst_10 [0] : vector<2x8x128xf32> to vector<8x128xf32>
    %cst_11 = arith.constant 0.000000e+00 : f32
    %24 = vector.broadcast %cst_11 : f32 to vector<8x128xf32>
    %c0_12 = arith.constant 0 : index
    %c0_13 = arith.constant 0 : index
    %c0_14 = arith.constant 0 : index
    %25 = vector.load %arg2[%c0_12, %c0_13, %c0_14] : memref<18x8x128xf32, #tpu.memory_space<vmem>>, vector<1x8x128xf32>
    %26 = vector.shape_cast %25 : vector<1x8x128xf32> to vector<8x128xf32>
    %cst_15 = arith.constant 1.000000e+01 : f32
    %27 = vector.broadcast %cst_15 : f32 to vector<8x128xf32>
    %28 = arith.mulf %26, %27 : vector<8x128xf32>
    %cst_16 = arith.constant dense<0xFF800000> : vector<8xf32>
    %29 = vector.multi_reduction <maximumf>, %28, %cst_16 [1] : vector<8x128xf32> to vector<8xf32>
    %30 = vector.shape_cast %29 : vector<8xf32> to vector<8x1xf32>
    %31 = vector.broadcast %30 : vector<8x1xf32> to vector<8x128xf32>
    %32 = arith.subf %28, %31 : vector<8x128xf32>
    %33 = math.exp %32 : vector<8x128xf32>
    %cst_17 = arith.constant dense<0.000000e+00> : vector<8x1xf32>
    %34 = tpu.matmul %33, %0, %cst_17 {dimension_numbers = #tpu.dot_dimension_numbers<[1], [0], [0], [1], [0, 0, 1, 1], [], []>} : vector<8x128xf32>, vector<128x1xf32>, vector<8x1xf32> -> vector<8x1xf32>
    %35 = math.log %34 : vector<8x1xf32>
    %36 = vector.broadcast %35 : vector<8x1xf32> to vector<8x128xf32>
    %37 = arith.subf %32, %36 : vector<8x128xf32>
    %38 = arith.addf %24, %37 : vector<8x128xf32>
    %39 = vector.extract_strided_slice %22 {offsets = [0, 0, 0], sizes = [1, 8, 128], strides = [1, 1, 1]} : vector<2x8x128xf32> to vector<1x8x128xf32>
    %40 = vector.shape_cast %39 : vector<1x8x128xf32> to vector<8x128xf32>
    %41 = arith.mulf %40, %37 : vector<8x128xf32>
    %cst_18 = arith.constant dense<0.000000e+00> : vector<8x1xf32>
    %42 = tpu.matmul %41, %0, %cst_18 {dimension_numbers = #tpu.dot_dimension_numbers<[1], [0], [0], [1], [0, 0, 1, 1], [], []>} : vector<8x128xf32>, vector<128x1xf32>, vector<8x1xf32> -> vector<8x1xf32>
    %43 = vector.shape_cast %42 : vector<8x1xf32> to vector<1x8x1xf32>
    %cst_19 = arith.constant dense<0.000000e+00> : vector<1xf32>
    %44 = vector.multi_reduction <add>, %43, %cst_19 [1, 2] : vector<1x8x1xf32> to vector<1xf32>
    %45 = vector.shape_cast %44 : vector<1xf32> to vector<1x1x1xf32>
    %46 = vector.extract %45[0, 0, 0] : f32 from vector<1x1x1xf32>
    %cst_20 = arith.constant 0.000000e+00 : f32
    %47 = arith.addf %cst_20, %46 : f32
    %c1 = arith.constant 1 : index
    %c0_21 = arith.constant 0 : index
    %c0_22 = arith.constant 0 : index
    %48 = vector.load %arg2[%c1, %c0_21, %c0_22] : memref<18x8x128xf32, #tpu.memory_space<vmem>>, vector<1x8x128xf32>
    %49 = vector.shape_cast %48 : vector<1x8x128xf32> to vector<8x128xf32>
    %cst_23 = arith.constant 1.000000e+01 : f32
    %50 = vector.broadcast %cst_23 : f32 to vector<8x128xf32>
    %51 = arith.mulf %49, %50 : vector<8x128xf32>
    %cst_24 = arith.constant dense<0xFF800000> : vector<8xf32>
    %52 = vector.multi_reduction <maximumf>, %51, %cst_24 [1] : vector<8x128xf32> to vector<8xf32>
    %53 = vector.shape_cast %52 : vector<8xf32> to vector<8x1xf32>
    %54 = vector.broadcast %53 : vector<8x1xf32> to vector<8x128xf32>
    %55 = arith.subf %51, %54 : vector<8x128xf32>
    %56 = math.exp %55 : vector<8x128xf32>
    %cst_25 = arith.constant dense<0.000000e+00> : vector<8x1xf32>
    %57 = tpu.matmul %56, %0, %cst_25 {dimension_numbers = #tpu.dot_dimension_numbers<[1], [0], [0], [1], [0, 0, 1, 1], [], []>} : vector<8x128xf32>, vector<128x1xf32>, vector<8x1xf32> -> vector<8x1xf32>
    %58 = math.log %57 : vector<8x1xf32>
    %59 = vector.broadcast %58 : vector<8x1xf32> to vector<8x128xf32>
    %60 = arith.subf %55, %59 : vector<8x128xf32>
    %61 = arith.addf %38, %60 : vector<8x128xf32>
    %62 = vector.extract_strided_slice %22 {offsets = [1, 0, 0], sizes = [1, 8, 128], strides = [1, 1, 1]} : vector<2x8x128xf32> to vector<1x8x128xf32>
    %63 = vector.shape_cast %62 : vector<1x8x128xf32> to vector<8x128xf32>
    %64 = arith.mulf %63, %60 : vector<8x128xf32>
    %cst_26 = arith.constant dense<0.000000e+00> : vector<8x1xf32>
    %65 = tpu.matmul %64, %0, %cst_26 {dimension_numbers = #tpu.dot_dimension_numbers<[1], [0], [0], [1], [0, 0, 1, 1], [], []>} : vector<8x128xf32>, vector<128x1xf32>, vector<8x1xf32> -> vector<8x1xf32>
    %66 = vector.shape_cast %65 : vector<8x1xf32> to vector<1x8x1xf32>
    %cst_27 = arith.constant dense<0.000000e+00> : vector<1xf32>
    %67 = vector.multi_reduction <add>, %66, %cst_27 [1, 2] : vector<1x8x1xf32> to vector<1xf32>
    %68 = vector.shape_cast %67 : vector<1xf32> to vector<1x1x1xf32>
    %69 = vector.extract %68[0, 0, 0] : f32 from vector<1x1x1xf32>
    %70 = arith.addf %47, %69 : f32
    %c2 = arith.constant 2 : index
    %c0_28 = arith.constant 0 : index
    %c0_29 = arith.constant 0 : index
    %71 = vector.load %arg2[%c2, %c0_28, %c0_29] : memref<18x8x128xf32, #tpu.memory_space<vmem>>, vector<1x8x128xf32>
    %72 = vector.shape_cast %71 : vector<1x8x128xf32> to vector<8x128xf32>
    %cst_30 = arith.constant 1.000000e+01 : f32
    %73 = vector.broadcast %cst_30 : f32 to vector<8x128xf32>
    %74 = arith.mulf %72, %73 : vector<8x128xf32>
    %cst_31 = arith.constant dense<0xFF800000> : vector<8xf32>
    %75 = vector.multi_reduction <maximumf>, %74, %cst_31 [1] : vector<8x128xf32> to vector<8xf32>
    %76 = vector.shape_cast %75 : vector<8xf32> to vector<8x1xf32>
    %77 = vector.broadcast %76 : vector<8x1xf32> to vector<8x128xf32>
    %78 = arith.subf %74, %77 : vector<8x128xf32>
    %79 = math.exp %78 : vector<8x128xf32>
    %cst_32 = arith.constant dense<0.000000e+00> : vector<8x1xf32>
    %80 = tpu.matmul %79, %0, %cst_32 {dimension_numbers = #tpu.dot_dimension_numbers<[1], [0], [0], [1], [0, 0, 1, 1], [], []>} : vector<8x128xf32>, vector<128x1xf32>, vector<8x1xf32> -> vector<8x1xf32>
    %81 = math.log %80 : vector<8x1xf32>
    %82 = vector.broadcast %81 : vector<8x1xf32> to vector<8x128xf32>
    %83 = arith.subf %78, %82 : vector<8x128xf32>
    %84 = arith.addf %61, %83 : vector<8x128xf32>
    %c3 = arith.constant 3 : index
    %c0_33 = arith.constant 0 : index
    %c0_34 = arith.constant 0 : index
    %85 = vector.load %arg2[%c3, %c0_33, %c0_34] : memref<18x8x128xf32, #tpu.memory_space<vmem>>, vector<1x8x128xf32>
    %86 = vector.shape_cast %85 : vector<1x8x128xf32> to vector<8x128xf32>
    %cst_35 = arith.constant 1.000000e+01 : f32
    %87 = vector.broadcast %cst_35 : f32 to vector<8x128xf32>
    %88 = arith.mulf %86, %87 : vector<8x128xf32>
    %cst_36 = arith.constant dense<0xFF800000> : vector<8xf32>
    %89 = vector.multi_reduction <maximumf>, %88, %cst_36 [1] : vector<8x128xf32> to vector<8xf32>
    %90 = vector.shape_cast %89 : vector<8xf32> to vector<8x1xf32>
    %91 = vector.broadcast %90 : vector<8x1xf32> to vector<8x128xf32>
    %92 = arith.subf %88, %91 : vector<8x128xf32>
    %93 = math.exp %92 : vector<8x128xf32>
    %cst_37 = arith.constant dense<0.000000e+00> : vector<8x1xf32>
    %94 = tpu.matmul %93, %0, %cst_37 {dimension_numbers = #tpu.dot_dimension_numbers<[1], [0], [0], [1], [0, 0, 1, 1], [], []>} : vector<8x128xf32>, vector<128x1xf32>, vector<8x1xf32> -> vector<8x1xf32>
    %95 = math.log %94 : vector<8x1xf32>
    %96 = vector.broadcast %95 : vector<8x1xf32> to vector<8x128xf32>
    %97 = arith.subf %92, %96 : vector<8x128xf32>
    %98 = arith.addf %84, %97 : vector<8x128xf32>
    %c4 = arith.constant 4 : index
    %c0_38 = arith.constant 0 : index
    %c0_39 = arith.constant 0 : index
    %99 = vector.load %arg2[%c4, %c0_38, %c0_39] : memref<18x8x128xf32, #tpu.memory_space<vmem>>, vector<1x8x128xf32>
    %100 = vector.shape_cast %99 : vector<1x8x128xf32> to vector<8x128xf32>
    %cst_40 = arith.constant 1.000000e+01 : f32
    %101 = vector.broadcast %cst_40 : f32 to vector<8x128xf32>
    %102 = arith.mulf %100, %101 : vector<8x128xf32>
    %cst_41 = arith.constant dense<0xFF800000> : vector<8xf32>
    %103 = vector.multi_reduction <maximumf>, %102, %cst_41 [1] : vector<8x128xf32> to vector<8xf32>
    %104 = vector.shape_cast %103 : vector<8xf32> to vector<8x1xf32>
    %105 = vector.broadcast %104 : vector<8x1xf32> to vector<8x128xf32>
    %106 = arith.subf %102, %105 : vector<8x128xf32>
    %107 = math.exp %106 : vector<8x128xf32>
    %cst_42 = arith.constant dense<0.000000e+00> : vector<8x1xf32>
    %108 = tpu.matmul %107, %0, %cst_42 {dimension_numbers = #tpu.dot_dimension_numbers<[1], [0], [0], [1], [0, 0, 1, 1], [], []>} : vector<8x128xf32>, vector<128x1xf32>, vector<8x1xf32> -> vector<8x1xf32>
    %109 = math.log %108 : vector<8x1xf32>
    %110 = vector.broadcast %109 : vector<8x1xf32> to vector<8x128xf32>
    %111 = arith.subf %106, %110 : vector<8x128xf32>
    %112 = arith.addf %98, %111 : vector<8x128xf32>
    %c5 = arith.constant 5 : index
    %c0_43 = arith.constant 0 : index
    %c0_44 = arith.constant 0 : index
    %113 = vector.load %arg2[%c5, %c0_43, %c0_44] : memref<18x8x128xf32, #tpu.memory_space<vmem>>, vector<1x8x128xf32>
    %114 = vector.shape_cast %113 : vector<1x8x128xf32> to vector<8x128xf32>
    %cst_45 = arith.constant 1.000000e+01 : f32
    %115 = vector.broadcast %cst_45 : f32 to vector<8x128xf32>
    %116 = arith.mulf %114, %115 : vector<8x128xf32>
    %cst_46 = arith.constant dense<0xFF800000> : vector<8xf32>
    %117 = vector.multi_reduction <maximumf>, %116, %cst_46 [1] : vector<8x128xf32> to vector<8xf32>
    %118 = vector.shape_cast %117 : vector<8xf32> to vector<8x1xf32>
    %119 = vector.broadcast %118 : vector<8x1xf32> to vector<8x128xf32>
    %120 = arith.subf %116, %119 : vector<8x128xf32>
    %121 = math.exp %120 : vector<8x128xf32>
    %cst_47 = arith.constant dense<0.000000e+00> : vector<8x1xf32>
    %122 = tpu.matmul %121, %0, %cst_47 {dimension_numbers = #tpu.dot_dimension_numbers<[1], [0], [0], [1], [0, 0, 1, 1], [], []>} : vector<8x128xf32>, vector<128x1xf32>, vector<8x1xf32> -> vector<8x1xf32>
    %123 = math.log %122 : vector<8x1xf32>
    %124 = vector.broadcast %123 : vector<8x1xf32> to vector<8x128xf32>
    %125 = arith.subf %120, %124 : vector<8x128xf32>
    %126 = arith.addf %112, %125 : vector<8x128xf32>
    %c6 = arith.constant 6 : index
    %c0_48 = arith.constant 0 : index
    %c0_49 = arith.constant 0 : index
    %127 = vector.load %arg2[%c6, %c0_48, %c0_49] : memref<18x8x128xf32, #tpu.memory_space<vmem>>, vector<1x8x128xf32>
    %128 = vector.shape_cast %127 : vector<1x8x128xf32> to vector<8x128xf32>
    %cst_50 = arith.constant 1.000000e+01 : f32
    %129 = vector.broadcast %cst_50 : f32 to vector<8x128xf32>
    %130 = arith.mulf %128, %129 : vector<8x128xf32>
    %cst_51 = arith.constant dense<0xFF800000> : vector<8xf32>
    %131 = vector.multi_reduction <maximumf>, %130, %cst_51 [1] : vector<8x128xf32> to vector<8xf32>
    %132 = vector.shape_cast %131 : vector<8xf32> to vector<8x1xf32>
    %133 = vector.broadcast %132 : vector<8x1xf32> to vector<8x128xf32>
    %134 = arith.subf %130, %133 : vector<8x128xf32>
    %135 = math.exp %134 : vector<8x128xf32>
    %cst_52 = arith.constant dense<0.000000e+00> : vector<8x1xf32>
    %136 = tpu.matmul %135, %0, %cst_52 {dimension_numbers = #tpu.dot_dimension_numbers<[1], [0], [0], [1], [0, 0, 1, 1], [], []>} : vector<8x128xf32>, vector<128x1xf32>, vector<8x1xf32> -> vector<8x1xf32>
    %137 = math.log %136 : vector<8x1xf32>
    %138 = vector.broadcast %137 : vector<8x1xf32> to vector<8x128xf32>
    %139 = arith.subf %134, %138 : vector<8x128xf32>
    %140 = arith.addf %126, %139 : vector<8x128xf32>
    %c7 = arith.constant 7 : index
    %c0_53 = arith.constant 0 : index
    %c0_54 = arith.constant 0 : index
    %141 = vector.load %arg2[%c7, %c0_53, %c0_54] : memref<18x8x128xf32, #tpu.memory_space<vmem>>, vector<1x8x128xf32>
    %142 = vector.shape_cast %141 : vector<1x8x128xf32> to vector<8x128xf32>
    %cst_55 = arith.constant 1.000000e+01 : f32
    %143 = vector.broadcast %cst_55 : f32 to vector<8x128xf32>
    %144 = arith.mulf %142, %143 : vector<8x128xf32>
    %cst_56 = arith.constant dense<0xFF800000> : vector<8xf32>
    %145 = vector.multi_reduction <maximumf>, %144, %cst_56 [1] : vector<8x128xf32> to vector<8xf32>
    %146 = vector.shape_cast %145 : vector<8xf32> to vector<8x1xf32>
    %147 = vector.broadcast %146 : vector<8x1xf32> to vector<8x128xf32>
    %148 = arith.subf %144, %147 : vector<8x128xf32>
    %149 = math.exp %148 : vector<8x128xf32>
    %cst_57 = arith.constant dense<0.000000e+00> : vector<8x1xf32>
    %150 = tpu.matmul %149, %0, %cst_57 {dimension_numbers = #tpu.dot_dimension_numbers<[1], [0], [0], [1], [0, 0, 1, 1], [], []>} : vector<8x128xf32>, vector<128x1xf32>, vector<8x1xf32> -> vector<8x1xf32>
    %151 = math.log %150 : vector<8x1xf32>
    %152 = vector.broadcast %151 : vector<8x1xf32> to vector<8x128xf32>
    %153 = arith.subf %148, %152 : vector<8x128xf32>
    %154 = arith.addf %140, %153 : vector<8x128xf32>
    %c8 = arith.constant 8 : index
    %c0_58 = arith.constant 0 : index
    %c0_59 = arith.constant 0 : index
    %155 = vector.load %arg2[%c8, %c0_58, %c0_59] : memref<18x8x128xf32, #tpu.memory_space<vmem>>, vector<1x8x128xf32>
    %156 = vector.shape_cast %155 : vector<1x8x128xf32> to vector<8x128xf32>
    %cst_60 = arith.constant 1.000000e+01 : f32
    %157 = vector.broadcast %cst_60 : f32 to vector<8x128xf32>
    %158 = arith.mulf %156, %157 : vector<8x128xf32>
    %cst_61 = arith.constant dense<0xFF800000> : vector<8xf32>
    %159 = vector.multi_reduction <maximumf>, %158, %cst_61 [1] : vector<8x128xf32> to vector<8xf32>
    %160 = vector.shape_cast %159 : vector<8xf32> to vector<8x1xf32>
    %161 = vector.broadcast %160 : vector<8x1xf32> to vector<8x128xf32>
    %162 = arith.subf %158, %161 : vector<8x128xf32>
    %163 = math.exp %162 : vector<8x128xf32>
    %cst_62 = arith.constant dense<0.000000e+00> : vector<8x1xf32>
    %164 = tpu.matmul %163, %0, %cst_62 {dimension_numbers = #tpu.dot_dimension_numbers<[1], [0], [0], [1], [0, 0, 1, 1], [], []>} : vector<8x128xf32>, vector<128x1xf32>, vector<8x1xf32> -> vector<8x1xf32>
    %165 = math.log %164 : vector<8x1xf32>
    %166 = vector.broadcast %165 : vector<8x1xf32> to vector<8x128xf32>
    %167 = arith.subf %162, %166 : vector<8x128xf32>
    %168 = arith.addf %154, %167 : vector<8x128xf32>
    %c9 = arith.constant 9 : index
    %c0_63 = arith.constant 0 : index
    %c0_64 = arith.constant 0 : index
    %169 = vector.load %arg2[%c9, %c0_63, %c0_64] : memref<18x8x128xf32, #tpu.memory_space<vmem>>, vector<1x8x128xf32>
    %170 = vector.shape_cast %169 : vector<1x8x128xf32> to vector<8x128xf32>
    %cst_65 = arith.constant 1.000000e+01 : f32
    %171 = vector.broadcast %cst_65 : f32 to vector<8x128xf32>
    %172 = arith.mulf %170, %171 : vector<8x128xf32>
    %cst_66 = arith.constant dense<0xFF800000> : vector<8xf32>
    %173 = vector.multi_reduction <maximumf>, %172, %cst_66 [1] : vector<8x128xf32> to vector<8xf32>
    %174 = vector.shape_cast %173 : vector<8xf32> to vector<8x1xf32>
    %175 = vector.broadcast %174 : vector<8x1xf32> to vector<8x128xf32>
    %176 = arith.subf %172, %175 : vector<8x128xf32>
    %177 = math.exp %176 : vector<8x128xf32>
    %cst_67 = arith.constant dense<0.000000e+00> : vector<8x1xf32>
    %178 = tpu.matmul %177, %0, %cst_67 {dimension_numbers = #tpu.dot_dimension_numbers<[1], [0], [0], [1], [0, 0, 1, 1], [], []>} : vector<8x128xf32>, vector<128x1xf32>, vector<8x1xf32> -> vector<8x1xf32>
    %179 = math.log %178 : vector<8x1xf32>
    %180 = vector.broadcast %179 : vector<8x1xf32> to vector<8x128xf32>
    %181 = arith.subf %176, %180 : vector<8x128xf32>
    %182 = arith.addf %168, %181 : vector<8x128xf32>
    %c10 = arith.constant 10 : index
    %c0_68 = arith.constant 0 : index
    %c0_69 = arith.constant 0 : index
    %183 = vector.load %arg2[%c10, %c0_68, %c0_69] : memref<18x8x128xf32, #tpu.memory_space<vmem>>, vector<1x8x128xf32>
    %184 = vector.shape_cast %183 : vector<1x8x128xf32> to vector<8x128xf32>
    %cst_70 = arith.constant 1.000000e+01 : f32
    %185 = vector.broadcast %cst_70 : f32 to vector<8x128xf32>
    %186 = arith.mulf %184, %185 : vector<8x128xf32>
    %cst_71 = arith.constant dense<0xFF800000> : vector<8xf32>
    %187 = vector.multi_reduction <maximumf>, %186, %cst_71 [1] : vector<8x128xf32> to vector<8xf32>
    %188 = vector.shape_cast %187 : vector<8xf32> to vector<8x1xf32>
    %189 = vector.broadcast %188 : vector<8x1xf32> to vector<8x128xf32>
    %190 = arith.subf %186, %189 : vector<8x128xf32>
    %191 = math.exp %190 : vector<8x128xf32>
    %cst_72 = arith.constant dense<0.000000e+00> : vector<8x1xf32>
    %192 = tpu.matmul %191, %0, %cst_72 {dimension_numbers = #tpu.dot_dimension_numbers<[1], [0], [0], [1], [0, 0, 1, 1], [], []>} : vector<8x128xf32>, vector<128x1xf32>, vector<8x1xf32> -> vector<8x1xf32>
    %193 = math.log %192 : vector<8x1xf32>
    %194 = vector.broadcast %193 : vector<8x1xf32> to vector<8x128xf32>
    %195 = arith.subf %190, %194 : vector<8x128xf32>
    %196 = arith.addf %182, %195 : vector<8x128xf32>
    %c11 = arith.constant 11 : index
    %c0_73 = arith.constant 0 : index
    %c0_74 = arith.constant 0 : index
    %197 = vector.load %arg2[%c11, %c0_73, %c0_74] : memref<18x8x128xf32, #tpu.memory_space<vmem>>, vector<1x8x128xf32>
    %198 = vector.shape_cast %197 : vector<1x8x128xf32> to vector<8x128xf32>
    %cst_75 = arith.constant 1.000000e+01 : f32
    %199 = vector.broadcast %cst_75 : f32 to vector<8x128xf32>
    %200 = arith.mulf %198, %199 : vector<8x128xf32>
    %cst_76 = arith.constant dense<0xFF800000> : vector<8xf32>
    %201 = vector.multi_reduction <maximumf>, %200, %cst_76 [1] : vector<8x128xf32> to vector<8xf32>
    %202 = vector.shape_cast %201 : vector<8xf32> to vector<8x1xf32>
    %203 = vector.broadcast %202 : vector<8x1xf32> to vector<8x128xf32>
    %204 = arith.subf %200, %203 : vector<8x128xf32>
    %205 = math.exp %204 : vector<8x128xf32>
    %cst_77 = arith.constant dense<0.000000e+00> : vector<8x1xf32>
    %206 = tpu.matmul %205, %0, %cst_77 {dimension_numbers = #tpu.dot_dimension_numbers<[1], [0], [0], [1], [0, 0, 1, 1], [], []>} : vector<8x128xf32>, vector<128x1xf32>, vector<8x1xf32> -> vector<8x1xf32>
    %207 = math.log %206 : vector<8x1xf32>
    %208 = vector.broadcast %207 : vector<8x1xf32> to vector<8x128xf32>
    %209 = arith.subf %204, %208 : vector<8x128xf32>
    %210 = arith.addf %196, %209 : vector<8x128xf32>
    %c12 = arith.constant 12 : index
    %c0_78 = arith.constant 0 : index
    %c0_79 = arith.constant 0 : index
    %211 = vector.load %arg2[%c12, %c0_78, %c0_79] : memref<18x8x128xf32, #tpu.memory_space<vmem>>, vector<1x8x128xf32>
    %212 = vector.shape_cast %211 : vector<1x8x128xf32> to vector<8x128xf32>
    %cst_80 = arith.constant 1.000000e+01 : f32
    %213 = vector.broadcast %cst_80 : f32 to vector<8x128xf32>
    %214 = arith.mulf %212, %213 : vector<8x128xf32>
    %cst_81 = arith.constant dense<0xFF800000> : vector<8xf32>
    %215 = vector.multi_reduction <maximumf>, %214, %cst_81 [1] : vector<8x128xf32> to vector<8xf32>
    %216 = vector.shape_cast %215 : vector<8xf32> to vector<8x1xf32>
    %217 = vector.broadcast %216 : vector<8x1xf32> to vector<8x128xf32>
    %218 = arith.subf %214, %217 : vector<8x128xf32>
    %219 = math.exp %218 : vector<8x128xf32>
    %cst_82 = arith.constant dense<0.000000e+00> : vector<8x1xf32>
    %220 = tpu.matmul %219, %0, %cst_82 {dimension_numbers = #tpu.dot_dimension_numbers<[1], [0], [0], [1], [0, 0, 1, 1], [], []>} : vector<8x128xf32>, vector<128x1xf32>, vector<8x1xf32> -> vector<8x1xf32>
    %221 = math.log %220 : vector<8x1xf32>
    %222 = vector.broadcast %221 : vector<8x1xf32> to vector<8x128xf32>
    %223 = arith.subf %218, %222 : vector<8x128xf32>
    %224 = arith.addf %210, %223 : vector<8x128xf32>
    %c13 = arith.constant 13 : index
    %c0_83 = arith.constant 0 : index
    %c0_84 = arith.constant 0 : index
    %225 = vector.load %arg2[%c13, %c0_83, %c0_84] : memref<18x8x128xf32, #tpu.memory_space<vmem>>, vector<1x8x128xf32>
    %226 = vector.shape_cast %225 : vector<1x8x128xf32> to vector<8x128xf32>
    %cst_85 = arith.constant 1.000000e+01 : f32
    %227 = vector.broadcast %cst_85 : f32 to vector<8x128xf32>
    %228 = arith.mulf %226, %227 : vector<8x128xf32>
    %cst_86 = arith.constant dense<0xFF800000> : vector<8xf32>
    %229 = vector.multi_reduction <maximumf>, %228, %cst_86 [1] : vector<8x128xf32> to vector<8xf32>
    %230 = vector.shape_cast %229 : vector<8xf32> to vector<8x1xf32>
    %231 = vector.broadcast %230 : vector<8x1xf32> to vector<8x128xf32>
    %232 = arith.subf %228, %231 : vector<8x128xf32>
    %233 = math.exp %232 : vector<8x128xf32>
    %cst_87 = arith.constant dense<0.000000e+00> : vector<8x1xf32>
    %234 = tpu.matmul %233, %0, %cst_87 {dimension_numbers = #tpu.dot_dimension_numbers<[1], [0], [0], [1], [0, 0, 1, 1], [], []>} : vector<8x128xf32>, vector<128x1xf32>, vector<8x1xf32> -> vector<8x1xf32>
    %235 = math.log %234 : vector<8x1xf32>
    %236 = vector.broadcast %235 : vector<8x1xf32> to vector<8x128xf32>
    %237 = arith.subf %232, %236 : vector<8x128xf32>
    %238 = arith.addf %224, %237 : vector<8x128xf32>
    %c14 = arith.constant 14 : index
    %c0_88 = arith.constant 0 : index
    %c0_89 = arith.constant 0 : index
    %239 = vector.load %arg2[%c14, %c0_88, %c0_89] : memref<18x8x128xf32, #tpu.memory_space<vmem>>, vector<1x8x128xf32>
    %240 = vector.shape_cast %239 : vector<1x8x128xf32> to vector<8x128xf32>
    %cst_90 = arith.constant 1.000000e+01 : f32
    %241 = vector.broadcast %cst_90 : f32 to vector<8x128xf32>
    %242 = arith.mulf %240, %241 : vector<8x128xf32>
    %cst_91 = arith.constant dense<0xFF800000> : vector<8xf32>
    %243 = vector.multi_reduction <maximumf>, %242, %cst_91 [1] : vector<8x128xf32> to vector<8xf32>
    %244 = vector.shape_cast %243 : vector<8xf32> to vector<8x1xf32>
    %245 = vector.broadcast %244 : vector<8x1xf32> to vector<8x128xf32>
    %246 = arith.subf %242, %245 : vector<8x128xf32>
    %247 = math.exp %246 : vector<8x128xf32>
    %cst_92 = arith.constant dense<0.000000e+00> : vector<8x1xf32>
    %248 = tpu.matmul %247, %0, %cst_92 {dimension_numbers = #tpu.dot_dimension_numbers<[1], [0], [0], [1], [0, 0, 1, 1], [], []>} : vector<8x128xf32>, vector<128x1xf32>, vector<8x1xf32> -> vector<8x1xf32>
    %249 = math.log %248 : vector<8x1xf32>
    %250 = vector.broadcast %249 : vector<8x1xf32> to vector<8x128xf32>
    %251 = arith.subf %246, %250 : vector<8x128xf32>
    %252 = arith.addf %238, %251 : vector<8x128xf32>
    %c15 = arith.constant 15 : index
    %c0_93 = arith.constant 0 : index
    %c0_94 = arith.constant 0 : index
    %253 = vector.load %arg2[%c15, %c0_93, %c0_94] : memref<18x8x128xf32, #tpu.memory_space<vmem>>, vector<1x8x128xf32>
    %254 = vector.shape_cast %253 : vector<1x8x128xf32> to vector<8x128xf32>
    %cst_95 = arith.constant 1.000000e+01 : f32
    %255 = vector.broadcast %cst_95 : f32 to vector<8x128xf32>
    %256 = arith.mulf %254, %255 : vector<8x128xf32>
    %cst_96 = arith.constant dense<0xFF800000> : vector<8xf32>
    %257 = vector.multi_reduction <maximumf>, %256, %cst_96 [1] : vector<8x128xf32> to vector<8xf32>
    %258 = vector.shape_cast %257 : vector<8xf32> to vector<8x1xf32>
    %259 = vector.broadcast %258 : vector<8x1xf32> to vector<8x128xf32>
    %260 = arith.subf %256, %259 : vector<8x128xf32>
    %261 = math.exp %260 : vector<8x128xf32>
    %cst_97 = arith.constant dense<0.000000e+00> : vector<8x1xf32>
    %262 = tpu.matmul %261, %0, %cst_97 {dimension_numbers = #tpu.dot_dimension_numbers<[1], [0], [0], [1], [0, 0, 1, 1], [], []>} : vector<8x128xf32>, vector<128x1xf32>, vector<8x1xf32> -> vector<8x1xf32>
    %263 = math.log %262 : vector<8x1xf32>
    %264 = vector.broadcast %263 : vector<8x1xf32> to vector<8x128xf32>
    %265 = arith.subf %260, %264 : vector<8x128xf32>
    %266 = arith.addf %252, %265 : vector<8x128xf32>
    %c16 = arith.constant 16 : index
    %c0_98 = arith.constant 0 : index
    %c0_99 = arith.constant 0 : index
    %267 = vector.load %arg2[%c16, %c0_98, %c0_99] : memref<18x8x128xf32, #tpu.memory_space<vmem>>, vector<1x8x128xf32>
    %268 = vector.shape_cast %267 : vector<1x8x128xf32> to vector<8x128xf32>
    %cst_100 = arith.constant 1.000000e+01 : f32
    %269 = vector.broadcast %cst_100 : f32 to vector<8x128xf32>
    %270 = arith.mulf %268, %269 : vector<8x128xf32>
    %cst_101 = arith.constant dense<0xFF800000> : vector<8xf32>
    %271 = vector.multi_reduction <maximumf>, %270, %cst_101 [1] : vector<8x128xf32> to vector<8xf32>
    %272 = vector.shape_cast %271 : vector<8xf32> to vector<8x1xf32>
    %273 = vector.broadcast %272 : vector<8x1xf32> to vector<8x128xf32>
    %274 = arith.subf %270, %273 : vector<8x128xf32>
    %275 = math.exp %274 : vector<8x128xf32>
    %cst_102 = arith.constant dense<0.000000e+00> : vector<8x1xf32>
    %276 = tpu.matmul %275, %0, %cst_102 {dimension_numbers = #tpu.dot_dimension_numbers<[1], [0], [0], [1], [0, 0, 1, 1], [], []>} : vector<8x128xf32>, vector<128x1xf32>, vector<8x1xf32> -> vector<8x1xf32>
    %277 = math.log %276 : vector<8x1xf32>
    %278 = vector.broadcast %277 : vector<8x1xf32> to vector<8x128xf32>
    %279 = arith.subf %274, %278 : vector<8x128xf32>
    %280 = arith.addf %266, %279 : vector<8x128xf32>
    %c17 = arith.constant 17 : index
    %c0_103 = arith.constant 0 : index
    %c0_104 = arith.constant 0 : index
    %281 = vector.load %arg2[%c17, %c0_103, %c0_104] : memref<18x8x128xf32, #tpu.memory_space<vmem>>, vector<1x8x128xf32>
    %282 = vector.shape_cast %281 : vector<1x8x128xf32> to vector<8x128xf32>
    %cst_105 = arith.constant 1.000000e+01 : f32
    %283 = vector.broadcast %cst_105 : f32 to vector<8x128xf32>
    %284 = arith.mulf %282, %283 : vector<8x128xf32>
    %cst_106 = arith.constant dense<0xFF800000> : vector<8xf32>
    %285 = vector.multi_reduction <maximumf>, %284, %cst_106 [1] : vector<8x128xf32> to vector<8xf32>
    %286 = vector.shape_cast %285 : vector<8xf32> to vector<8x1xf32>
    %287 = vector.broadcast %286 : vector<8x1xf32> to vector<8x128xf32>
    %288 = arith.subf %284, %287 : vector<8x128xf32>
    %289 = math.exp %288 : vector<8x128xf32>
    %cst_107 = arith.constant dense<0.000000e+00> : vector<8x1xf32>
    %290 = tpu.matmul %289, %0, %cst_107 {dimension_numbers = #tpu.dot_dimension_numbers<[1], [0], [0], [1], [0, 0, 1, 1], [], []>} : vector<8x128xf32>, vector<128x1xf32>, vector<8x1xf32> -> vector<8x1xf32>
    %291 = math.log %290 : vector<8x1xf32>
    %292 = vector.broadcast %291 : vector<8x1xf32> to vector<8x128xf32>
    %293 = arith.subf %288, %292 : vector<8x128xf32>
    %294 = arith.addf %280, %293 : vector<8x128xf32>
    %295 = arith.mulf %23, %294 : vector<8x128xf32>
    %cst_108 = arith.constant dense<0.000000e+00> : vector<8x1xf32>
    %296 = tpu.matmul %295, %0, %cst_108 {dimension_numbers = #tpu.dot_dimension_numbers<[1], [0], [0], [1], [0, 0, 1, 1], [], []>} : vector<8x128xf32>, vector<128x1xf32>, vector<8x1xf32> -> vector<8x1xf32>
    %297 = vector.shape_cast %296 : vector<8x1xf32> to vector<1x8x1xf32>
    %cst_109 = arith.constant dense<0.000000e+00> : vector<1xf32>
    %298 = vector.multi_reduction <add>, %297, %cst_109 [1, 2] : vector<1x8x1xf32> to vector<1xf32>
    %299 = vector.shape_cast %298 : vector<1xf32> to vector<1x1x1xf32>
    %300 = vector.extract %299[0, 0, 0] : f32 from vector<1x1x1xf32>
    %301 = arith.subf %70, %300 : f32
    %302 = vector.broadcast %301 : f32 to vector<1x128xf32>
    %303 = tpu.concatenate %6, %302 in 0 : vector<1x128xf32>, vector<1x128xf32> -> vector<2x128xf32>
    %304 = vector.shape_cast %303 : vector<2x128xf32> to vector<1x2x128xf32>
    %c0_110 = arith.constant 0 : index
    %c0_111 = arith.constant 0 : index
    %c0_112 = arith.constant 0 : index
    %305 = vector.load %arg5[%c0_110, %c0_111, %c0_112] : memref<1x2x128xf32, #tpu.memory_space<vmem>>, vector<1x2x128xf32>
    tpu.vector_store %arg5[%c0_110, %c0_111, %c0_112], %304 {strides = array<i32>} : memref<1x2x128xf32, #tpu.memory_space<vmem>>, vector<1x2x128xf32>,
    return
  }
  func.func @transform_0(%arg0: i32) -> (i32, i32) {
    %c0_i32 = arith.constant 0 : i32
    %c0_i32_0 = arith.constant 0 : i32
    %c0_i32_1 = arith.constant 0 : i32
    return %c0_i32, %c0_i32_0 : i32, i32
  }
  func.func @transform_1(%arg0: i32) -> (i32, i32, i32) {
    %c0_i32 = arith.constant 0 : i32
    %c0_i32_0 = arith.constant 0 : i32
    %c0_i32_1 = arith.constant 0 : i32
    return %c0_i32, %arg0, %c0_i32_0 : i32, i32, i32
  }
  func.func @transform_2(%arg0: i32) -> (i32, i32, i32) {
    %c0_i32 = arith.constant 0 : i32
    %c0_i32_0 = arith.constant 0 : i32
    %c0_i32_1 = arith.constant 0 : i32
    return %c0_i32, %arg0, %c0_i32_0 : i32, i32, i32
  }
  func.func @transform_3(%arg0: i32) -> (i32, i32) {
    %c0_i32 = arith.constant 0 : i32
    %c0_i32_0 = arith.constant 0 : i32
    %c0_i32_1 = arith.constant 0 : i32
    return %c0_i32, %c0_i32_0 : i32, i32
  }
  func.func @transform_4(%arg0: i32) -> (i32, i32, i32) {
    %c0_i32 = arith.constant 0 : i32
    %c0_i32_0 = arith.constant 0 : i32
    %c0_i32_1 = arith.constant 0 : i32
    return %arg0, %c0_i32, %c0_i32_0 : i32, i32, i32
  }
}

</mosaic_0001>

<bundles_post_ra>
// kernel: tpu_custom_call.1
= control target key start
LH: loop header
LB: loop body
LE: loop exit
PB: predicated region body
PF: predicated region fallthrough
CT: control target
= control target key end

     0   :  { %10 = vsyncpa [#allocation4], 0  ;;  %s1677_s0 = inlined_call_operand.<no memory space> [shape: f32[1,1], index: 0, kind: input, shape index: {}]   ;;  %s1678_s1 = inlined_call_operand.hbm [shape: f32[18,8,128], index: 1, kind: input, shape index: {}]   ;;  %s1679_s2 = inlined_call_operand.hbm [shape: f32[2,8,128], index: 2, kind: input, shape index: {}]   ;;  %s1680_s3 = inlined_call_operand.vmem [shape: f32[1,128], index: 3, kind: input, shape index: {}]   ;;  %s1681_s4 = inlined_call_operand.hbm [shape: f32[1,2,128], index: 4, kind: output, shape index: {}]  }
   0x1   :  { %11 = vsyncpa [#allocation7], 0 }
   0x2   :  { %12 = vsyncpa [#allocation5], 0  ;;  %s19_s17 = sshll.u32 %s1678_s1, 4  ;;  %s1097_s18 = smov [#allocation3]   ;;  %s20_s17 = int_to_ptr.hbm [resolvable:$true] %s19_s17 }
   0x3   :  { %s21_s19 = sshll.u32 %s1097_s18, 4  ;;  %s32_s22 = sshll.u32 %s1679_s2, 4  ;;  %s22_s19 = int_to_ptr.vmem [resolvable:$true] %s21_s19  ;;  %s33_s22 = int_to_ptr.hbm [resolvable:$true] %s32_s22 }
   0x4   :  { %s1098_s23 = smov 128   ;;  %s1099_s24 = smov 8  }
   0x5   :  { %27 = dma.hbm_to_vmem [thread:$0]  %s20_s17, 2304, %s22_s19, [#allocation4], %s1098_s23, %s1098_s23, %s1099_s24  }
   0x6   :  { %s1100_s25 = smov [#allocation6]  }
   0x7   :  { %s34_s26 = sshll.u32 %s1100_s25, 4  ;;  %s35_s26 = int_to_ptr.vmem [resolvable:$true] %s34_s26 }
   0x8   :  { %40 = dma.hbm_to_vmem [thread:$0]  %s33_s22, 256, %s35_s26, [#allocation7], %s1098_s23, %s1098_s23, %s1099_s24  }
   0x9   :  { %1091 = dma.done.wait [#allocation4], 2304  }
   0xa   :  { %1092 = vsyncadd [#allocation4], 4294964992 }
   0xb   :  { %1093 = dma.done.wait [#allocation7], 256  }
   0xc   :  { %1094 = vsyncadd [#allocation7], 4294967040  ;;  %v55_v0 = vstv %s1677_s0  ;;  %v204_v2 = vld [vmem:[#allocation3 + $0x8] sm:$0xff]  ;;  %v134_v3 = vld [vmem:[#allocation3] sm:$0xff]  ;;  %v1101_v18 = vmov 1.0   ;;  %v1102_v48 = vmov 0  }
   0xd   :  { %937 = vrcp.f32 %v55_v0  ;;  %v1138_v4 = vmul.f32 10.0, %v204_v2  ;;  %v1140_v5 = vmul.f32 10.0, %v134_v3  ;;  %v67_v7 = vand.u32 2147483648, %v55_v0  ;;  %v1144_v15 = vld [vmem:[#allocation6 + $0x8] sm:$0xff]  ;;  %v1146_v16 = vld [vmem:[#allocation6] sm:$0xff]  ;;  %141 = vmatpush.msra.mxu1 %v1101_v18  ;;  %211 = vmatpush.msra.mxu3 %v1101_v18  ;;  %v347_v25 = vld [vmem:[#allocation3 + $0x20] sm:$0xff] }
   0xe   :  { %vm61_vm0 = vweird.f32 %v55_v0  ;;  %v65_v9 = vand.u32 2147483647, %v55_v0  ;;  %v1150_v17 = vadd.f32 %v1144_v15, %v1146_v16  ;;  %96 = vmatpush.msra.mxu0 %v1101_v18  ;;  %171 = vmatpush.msra.mxu2 %v1101_v18  ;;  %v936_v19 = vld [vmem:[%s1680_s3] ss:$0 sm:$0xff]  ;;  %v1291_v26 = vmul.f32 10.0, %v347_v25  ;;  %v310_v35 = vld [vmem:[#allocation3 + $0x18] sm:$0xff] }
   0xf   :  { %206 = vmax.xlane.f32.xlu1 %v1138_v4  ;;  %136 = vmax.xlane.f32.xlu0 %v1140_v5  ;;  %v68_v11 = vor.u32 1.1754944e-38, %v67_v7  ;;  %v82_v20 = vsub.f32 %v1144_v15, %v936_v19  ;;  %v81_v21 = vsub.f32 %v1146_v16, %v936_v19  ;;  %v1334_v36 = vmul.f32 10.0, %v310_v35  ;;  %v458_v60 = vld [vmem:[#allocation3 + $0x38] sm:$0xff]  ;;  %v532_v61 = vld [vmem:[#allocation3 + $0x48] sm:$0xff]  ;;  %v273_v3 = vld [vmem:[#allocation3 + $0x10] sm:$0xff]  ;;  %s1103_s5 = smov [#allocation8]  }
  0x10   :  { %vm66_vm3 = vcmp.eq.f32.partialorder %v65_v9, 8.507059e+37  ;;  %142 = vmatpush.msra.mxu1 %v1101_v18  ;;  %212 = vmatpush.msra.mxu3 %v1101_v18  ;;  %v1381_v62 = vmul.f32 10.0, %v532_v61  ;;  %v1383_v63 = vmul.f32 10.0, %v458_v60  ;;  %v495_v7 = vld [vmem:[#allocation3 + $0x40] sm:$0xff]  ;;  %v717_v15 = vld [vmem:[#allocation3 + $0x70] sm:$0xff]  ;;  %vm191_vm4 = vcmask 7168  }
  0x11   :  { %97 = vmatpush.msra.mxu0 %v1101_v18  ;;  %172 = vmatpush.msra.mxu2 %v1101_v18  ;;  %v1396_v9 = vmul.f32 10.0, %v495_v7  ;;  %s905_s6 = sshll.u32 %s1103_s5, 4  ;;  %s907_s10 = sshll.u32 %s1681_s4, 4  ;;  %vm897_vm5 = vcmask 1040384   ;;  %s906_s6 = int_to_ptr.vmem [resolvable:$true] %s905_s6  ;;  %s908_s10 = int_to_ptr.hbm [resolvable:$true] %s907_s10 }
  0x12   :  { %143 = vmatpush.msra.mxu1 %v1101_v18  ;;  %213 = vmatpush.msra.mxu3 %v1101_v18 }
  0x13   :  { %v938_v1 = vpop.eup %937  ;;  %98 = vmatpush.msra.mxu0 %v1101_v18  ;;  %173 = vmatpush.msra.mxu2 %v1101_v18 }
  0x14   :  { %v57_v6 = vmul.f32 %v938_v1, %v55_v0  ;;  %vm62_vm1 = vweird.f32 %v938_v1  ;;  %144 = vmatpush.msra.mxu1 %v1101_v18  ;;  %214 = vmatpush.msra.mxu3 %v1101_v18  ;;  %v643_v0 = vld [vmem:[#allocation3 + $0x60] sm:$0xff] }
  0x15   :  { %vm63_vm2 = vmor %vm61_vm0, %vm62_vm1  ;;  %99 = vmatpush.msra.mxu0 %v1101_v18  ;;  %174 = vmatpush.msra.mxu2 %v1101_v18  ;;  %v1387_v2 = vmul.f32 10.0, %v643_v0 }
  0x16   :  { %v58_v8 = vsub.f32 1.0, %v57_v6  ;;  %145 = vmatpush.msra.mxu1 %v1101_v18  ;;  %215 = vmatpush.msra.mxu3 %v1101_v18 }
  0x17   :  { %100 = vmatpush.msra.mxu0 %v1101_v18  ;;  %175 = vmatpush.msra.mxu2 %v1101_v18 }
  0x18   :  { %v59_v10 = vmul.f32 %v938_v1, %v58_v8  ;;  %146 = vmatpush.msra.mxu1 %v1101_v18  ;;  %216 = vmatpush.msra.mxu3 %v1101_v18  ;;  %v754_v8 = vld [vmem:[#allocation3 + $0x78] sm:$0xff] }
  0x19   :  { %101 = vmatpush.msra.mxu0 %v1101_v18  ;;  %176 = vmatpush.msra.mxu2 %v1101_v18 }
  0x1a   :  { %v60_v12 = vadd.f32 %v938_v1, %v59_v10  ;;  %147 = vmatpush.msra.mxu1 %v1101_v18  ;;  %217 = vmatpush.msra.mxu3 %v1101_v18  ;;  %v1398_v10 = vmul.f32 10.0, %v754_v8 }
  0x1b   :  { %102 = vmatpush.msra.mxu0 %v1101_v18  ;;  %177 = vmatpush.msra.mxu2 %v1101_v18 }
  0x1c   :  { %v64_v13 = vsel %vm63_vm2, %v938_v1, %v60_v12  ;;  %148 = vmatpush.msra.mxu1 %v1101_v18  ;;  %218 = vmatpush.msra.mxu3 %v1101_v18  ;;  %v384_v1 = vld [vmem:[#allocation3 + $0x28] sm:$0xff] }
  0x1d   :  { %v69_v14 = vsel %vm66_vm3, %v68_v11, %v64_v13  ;;  %103 = vmatpush.msra.mxu0 %v1101_v18  ;;  %178 = vmatpush.msra.mxu2 %v1101_v18  ;;  %v680_v11 = vld [vmem:[#allocation3 + $0x68] sm:$0xff] }
  0x1e   :  { %918 = vpush %v69_v14  ;;  %149 = vmatpush.msra.mxu1 %v1101_v18  ;;  %219 = vmatpush.msra.mxu3 %v1101_v18  ;;  %v1400_v12 = vmul.f32 10.0, %v680_v11  ;;  %v421_v14 = vld [vmem:[#allocation3 + $0x30] sm:$0xff] }
  0x1f   :  { %104 = vmatpush.msra.mxu0 %v1101_v18  ;;  %179 = vmatpush.msra.mxu2 %v1101_v18 }
  0x20   :  { %150 = vmatpush.msra.mxu1 %v1101_v18  ;;  %220 = vmatpush.msra.mxu3 %v1101_v18 }
  0x21   :  { %105 = vmatpush.msra.mxu0 %v1101_v18  ;;  %180 = vmatpush.msra.mxu2 %v1101_v18 }
  0x22   :  { %151 = vmatpush.msra.mxu1 %v1101_v18  ;;  %221 = vmatpush.msra.mxu3 %v1101_v18 }
  0x23   :  { %106 = vmatpush.msra.mxu0 %v1101_v18  ;;  %181 = vmatpush.msra.mxu2 %v1101_v18 }
  0x24   :  { %152 = vmatpush.msra.mxu1 %v1101_v18  ;;  %222 = vmatpush.msra.mxu3 %v1101_v18 }
  0x25   :  { %107 = vmatpush.msra.mxu0 %v1101_v18  ;;  %182 = vmatpush.msra.mxu2 %v1101_v18 }
  0x26   :  { %153 = vmatpush.msra.mxu1 %v1101_v18  ;;  %223 = vmatpush.msra.mxu3 %v1101_v18 }
  0x27   :  { %108 = vmatpush.msra.mxu0 %v1101_v18  ;;  %183 = vmatpush.msra.mxu2 %v1101_v18 }
  0x28   :  { %154 = vmatpush.msra.mxu1 %v1101_v18  ;;  %224 = vmatpush.msra.mxu3 %v1101_v18 }
  0x29   :  { %109 = vmatpush.msra.mxu0 %v1101_v18  ;;  %184 = vmatpush.msra.mxu2 %v1101_v18 }
  0x2a   :  { %155 = vmatpush.msra.mxu1 %v1101_v18  ;;  %225 = vmatpush.msra.mxu3 %v1101_v18 }
  0x2b   :  { %110 = vmatpush.msra.mxu0 %v1101_v18  ;;  %185 = vmatpush.msra.mxu2 %v1101_v18 }
  0x2c   :  { %156 = vmatpush.msra.mxu1 %v1101_v18  ;;  %226 = vmatpush.msra.mxu3 %v1101_v18 }
  0x2d   :  { %111 = vmatpush.msra.mxu0 %v1101_v18  ;;  %186 = vmatpush.msra.mxu2 %v1101_v18 }
  0x2e   :  { %354 = vmatpush.msrb.mxu3 %v1101_v18  ;;  %280 = vmatpush.msrb.mxu1 %v1101_v18 }
  0x2f   :  { %241 = vmatpush.msrb.mxu0 %v1101_v18  ;;  %317 = vmatpush.msrb.mxu2 %v1101_v18 }
  0x30   :  { %355 = vmatpush.msrb.mxu3 %v1101_v18  ;;  %281 = vmatpush.msrb.mxu1 %v1101_v18 }
  0x31   :  { %242 = vmatpush.msrb.mxu0 %v1101_v18  ;;  %318 = vmatpush.msrb.mxu2 %v1101_v18 }
  0x32   :  { %356 = vmatpush.msrb.mxu3 %v1101_v18  ;;  %282 = vmatpush.msrb.mxu1 %v1101_v18 }
  0x33   :  { %243 = vmatpush.msrb.mxu0 %v1101_v18  ;;  %319 = vmatpush.msrb.mxu2 %v1101_v18 }
  0x34   :  { %357 = vmatpush.msrb.mxu3 %v1101_v18  ;;  %283 = vmatpush.msrb.mxu1 %v1101_v18 }
  0x35   :  { %244 = vmatpush.msrb.mxu0 %v1101_v18  ;;  %320 = vmatpush.msrb.mxu2 %v1101_v18 }
  0x36   :  { %358 = vmatpush.msrb.mxu3 %v1101_v18  ;;  %284 = vmatpush.msrb.mxu1 %v1101_v18 }
  0x37   :  { %245 = vmatpush.msrb.mxu0 %v1101_v18  ;;  %321 = vmatpush.msrb.mxu2 %v1101_v18 }
  0x38   :  { %359 = vmatpush.msrb.mxu3 %v1101_v18  ;;  %285 = vmatpush.msrb.mxu1 %v1101_v18 }
  0x39   :  { %246 = vmatpush.msrb.mxu0 %v1101_v18  ;;  %322 = vmatpush.msrb.mxu2 %v1101_v18 }
  0x3a   :  { %360 = vmatpush.msrb.mxu3 %v1101_v18  ;;  %286 = vmatpush.msrb.mxu1 %v1101_v18 }
  0x3b   :  { %247 = vmatpush.msrb.mxu0 %v1101_v18  ;;  %323 = vmatpush.msrb.mxu2 %v1101_v18 }
  0x3c   :  { %361 = vmatpush.msrb.mxu3 %v1101_v18  ;;  %287 = vmatpush.msrb.mxu1 %v1101_v18 }
  0x3d   :  { %248 = vmatpush.msrb.mxu0 %v1101_v18  ;;  %324 = vmatpush.msrb.mxu2 %v1101_v18 }
  0x3e   :  { %362 = vmatpush.msrb.mxu3 %v1101_v18  ;;  %288 = vmatpush.msrb.mxu1 %v1101_v18 }
  0x3f   :  { %249 = vmatpush.msrb.mxu0 %v1101_v18  ;;  %325 = vmatpush.msrb.mxu2 %v1101_v18 }
  0x40   :  { %363 = vmatpush.msrb.mxu3 %v1101_v18  ;;  %289 = vmatpush.msrb.mxu1 %v1101_v18 }
  0x41   :  { %250 = vmatpush.msrb.mxu0 %v1101_v18  ;;  %326 = vmatpush.msrb.mxu2 %v1101_v18 }
  0x42   :  { %364 = vmatpush.msrb.mxu3 %v1101_v18  ;;  %290 = vmatpush.msrb.mxu1 %v1101_v18 }
  0x43   :  { %251 = vmatpush.msrb.mxu0 %v1101_v18  ;;  %327 = vmatpush.msrb.mxu2 %v1101_v18 }
  0x44   :  { %365 = vmatpush.msrb.mxu3 %v1101_v18  ;;  %291 = vmatpush.msrb.mxu1 %v1101_v18 }
  0x45   :  { %252 = vmatpush.msrb.mxu0 %v1101_v18  ;;  %328 = vmatpush.msrb.mxu2 %v1101_v18 }
  0x46   :  { %366 = vmatpush.msrb.mxu3 %v1101_v18  ;;  %292 = vmatpush.msrb.mxu1 %v1101_v18 }
  0x47   :  { %253 = vmatpush.msrb.mxu0 %v1101_v18  ;;  %329 = vmatpush.msrb.mxu2 %v1101_v18 }
  0x48   :  { %367 = vmatpush.msrb.mxu3 %v1101_v18  ;;  %293 = vmatpush.msrb.mxu1 %v1101_v18 }
  0x49   :  { %254 = vmatpush.msrb.mxu0 %v1101_v18  ;;  %330 = vmatpush.msrb.mxu2 %v1101_v18 }
  0x4a   :  { %368 = vmatpush.msrb.mxu3 %v1101_v18  ;;  %294 = vmatpush.msrb.mxu1 %v1101_v18 }
  0x4b   :  { %255 = vmatpush.msrb.mxu0 %v1101_v18  ;;  %331 = vmatpush.msrb.mxu2 %v1101_v18 }
  0x4c   :  { %369 = vmatpush.msrb.mxu3 %v1101_v18  ;;  %295 = vmatpush.msrb.mxu1 %v1101_v18 }
  0x4d   :  { %256 = vmatpush.msrb.mxu0 %v1101_v18  ;;  %332 = vmatpush.msrb.mxu2 %v1101_v18 }
  0x4e   :  { %312 = vmax.xlane.f32.xlu2 %v1334_v36  ;;  %934 = vset.pattern.permute.xlu1 %v1102_v48 }
  0x4f   :  { %s919_s3 = spop %918  ;;  %933 = vset.pattern.permute.xlu2 %v1102_v48  ;;  %935 = vset.pattern.permute.xlu0 %v1102_v48 }
  0x50   :  { %v83_v22 = vstv %s919_s3 }
  0x51   :  { %v1215_v23 = vmul.f32 %v83_v22, %v82_v20  ;;  %v1217_v24 = vmul.f32 %v83_v22, %v81_v21  ;;  %v1407_v21 = vmul.f32 10.0, %v421_v14  ;;  %v1409_v22 = vmul.f32 10.0, %v717_v15 }
  0x53   :  { %88 = vmax.xlane.f32.xlu1 %v1215_v23  ;;  %86 = vmax.xlane.f32.xlu0 %v1217_v24 }
  0x5b   :  { %349 = vmax.xlane.f32.xlu1 %v1291_v26 }
  0x82   :  { %v207_v27 = vpop.xlane.xlu1 %206  ;;  %v137_v28 = vpop.xlane.xlu0 %136 }
  0x83   :  { %v1295_v29 = vsub.f32 %v1138_v4, %v207_v27  ;;  %v1298_v30 = vsub.f32 %v1140_v5, %v137_v28  ;;  %v1389_v4 = vmul.f32 10.0, %v384_v1  ;;  %v1392_v5 = vmul.f32 10.0, %v273_v3  ;;  %v828_v27 = vld [vmem:[#allocation3 + $0x88] sm:$0xff] }
  0x84   :  { %v1417_v28 = vmul.f32 10.0, %v828_v27 }
  0x85   :  { %v209_v31 = vmul.f32 1.442695, %v1295_v29  ;;  %v139_v32 = vmul.f32 1.442695, %v1298_v30 }
  0x87   :  { %939 = vpow2.f32 %v209_v31 }
  0x88   :  { %941 = vpow2.f32 %v139_v32 }
  0x8d   :  { %v940_v33 = vpop.eup %939 }
  0x8e   :  { %v942_v34 = vpop.eup %941  ;;  %227 = vmatmul.f32.vlgmr.msra.gmra.mxu3 %v940_v33  ;;  %v791_v33 = vld [vmem:[#allocation3 + $0x80] sm:$0xff] }
  0x8f   :  { %157 = vmatmul.f32.vlgmr.msra.gmra.mxu1 %v942_v34  ;;  %502 = vmatpush.msra.mxu3 %v1101_v18  ;;  %v1424_v34 = vmul.f32 10.0, %v791_v33 }
  0x90   :  { %428 = vmatpush.msra.mxu1 %v1101_v18 }
  0x91   :  { %503 = vmatpush.msra.mxu3 %v1101_v18 }
  0x92   :  { %429 = vmatpush.msra.mxu1 %v1101_v18 }
  0x93   :  { %504 = vmatpush.msra.mxu3 %v1101_v18 }
  0x94   :  { %430 = vmatpush.msra.mxu1 %v1101_v18 }
  0x95   :  { %505 = vmatpush.msra.mxu3 %v1101_v18 }
  0x96   :  { %431 = vmatpush.msra.mxu1 %v1101_v18 }
  0x97   :  { %506 = vmatpush.msra.mxu3 %v1101_v18 }
  0x98   :  { %432 = vmatpush.msra.mxu1 %v1101_v18 }
  0x99   :  { %507 = vmatpush.msra.mxu3 %v1101_v18 }
  0x9a   :  { %433 = vmatpush.msra.mxu1 %v1101_v18 }
  0x9b   :  { %508 = vmatpush.msra.mxu3 %v1101_v18 }
  0x9c   :  { %434 = vmatpush.msra.mxu1 %v1101_v18 }
  0x9d   :  { %509 = vmatpush.msra.mxu3 %v1101_v18 }
  0x9e   :  { %435 = vmatpush.msra.mxu1 %v1101_v18 }
  0x9f   :  { %510 = vmatpush.msra.mxu3 %v1101_v18 }
  0xa0   :  { %436 = vmatpush.msra.mxu1 %v1101_v18 }
  0xa1   :  { %511 = vmatpush.msra.mxu3 %v1101_v18 }
  0xa2   :  { %437 = vmatpush.msra.mxu1 %v1101_v18 }
  0xa3   :  { %512 = vmatpush.msra.mxu3 %v1101_v18 }
  0xa4   :  { %438 = vmatpush.msra.mxu1 %v1101_v18 }
  0xa5   :  { %513 = vmatpush.msra.mxu3 %v1101_v18 }
  0xa6   :  { %439 = vmatpush.msra.mxu1 %v1101_v18 }
  0xa7   :  { %514 = vmatpush.msra.mxu3 %v1101_v18 }
  0xa8   :  { %440 = vmatpush.msra.mxu1 %v1101_v18 }
  0xa9   :  { %515 = vmatpush.msra.mxu3 %v1101_v18 }
  0xaa   :  { %441 = vmatpush.msra.mxu1 %v1101_v18 }
  0xab   :  { %516 = vmatpush.msra.mxu3 %v1101_v18 }
  0xac   :  { %442 = vmatpush.msra.mxu1 %v1101_v18 }
  0xad   :  { %517 = vmatpush.msra.mxu3 %v1101_v18 }
  0xae   :  { %443 = vmatpush.msra.mxu1 %v1101_v18 }
  0xc1   :  { %v313_v6 = vpop.xlane.xlu2 %312 }
  0xc2   :  { %v1427_v35 = vsub.f32 %v1334_v36, %v313_v6 }
  0xc6   :  { %v87_v37 = vpop.xlane.xlu0 %86  ;;  %v89_v39 = vpop.xlane.xlu1 %88 }
  0xc7   :  { %v90_v38 = vsub.f32 %v1217_v24, %v87_v37  ;;  %v91_v41 = vsub.f32 %v1215_v23, %v89_v39  ;;  %v606_v24 = vld [vmem:[#allocation3 + $0x58] sm:$0xff]  ;;  %v315_v39 = vmul.f32 1.442695, %v1427_v35 }
  0xc8   :  { %v1415_v25 = vmul.f32 10.0, %v606_v24 }
  0xc9   :  { %v92_v40 = vmul.f32 1.442695, %v90_v38  ;;  %v94_v42 = vmul.f32 1.442695, %v91_v41 }
  0xcb   :  { %943 = vpow2.f32 %v92_v40 }
  0xcc   :  { %945 = vpow2.f32 %v94_v42 }
  0xce   :  { %v350_v45 = vpop.xlane.xlu1 %349 }
  0xcf   :  { %v1362_v46 = vsub.f32 %v1291_v26, %v350_v45 }
  0xd1   :  { %v1339_v43 = vpop.eup %943  ;;  %v352_v47 = vmul.f32 1.442695, %v1362_v46 }
  0xd2   :  { %112 = vmatmul.f32.vlgmr.msra.gmra.mxu0 %v1339_v43  ;;  %v1345_v44 = vpop.eup %945 }
  0xd3   :  { %391 = vmatpush.msra.mxu0 %v1101_v18  ;;  %947 = vpow2.f32 %v352_v47 }
  0xd5   :  { %392 = vmatpush.msra.mxu0 %v1101_v18 }
  0xd7   :  { %393 = vmatpush.msra.mxu0 %v1101_v18 }
  0xd9   :  { %394 = vmatpush.msra.mxu0 %v1101_v18  ;;  %v948_v49 = vpop.eup %947 }
  0xda   :  { %115 = vmatmul.f32.gmra.mxu0 %v1345_v44  ;;  %370 = vmatmul.f32.vlgmr.msrb.gmra.mxu3 %v948_v49 }
  0xdb   :  { %395 = vmatpush.msra.mxu0 %v1101_v18  ;;  %650 = vmatpush.msrb.mxu3 %v1101_v18 }
  0xdd   :  { %396 = vmatpush.msra.mxu0 %v1101_v18  ;;  %651 = vmatpush.msrb.mxu3 %v1101_v18 }
  0xdf   :  { %397 = vmatpush.msra.mxu0 %v1101_v18  ;;  %652 = vmatpush.msrb.mxu3 %v1101_v18 }
  0xe1   :  { %398 = vmatpush.msra.mxu0 %v1101_v18  ;;  %653 = vmatpush.msrb.mxu3 %v1101_v18 }
  0xe3   :  { %399 = vmatpush.msra.mxu0 %v1101_v18  ;;  %654 = vmatpush.msrb.mxu3 %v1101_v18 }
  0xe5   :  { %400 = vmatpush.msra.mxu0 %v1101_v18  ;;  %655 = vmatpush.msrb.mxu3 %v1101_v18 }
  0xe7   :  { %401 = vmatpush.msra.mxu0 %v1101_v18  ;;  %656 = vmatpush.msrb.mxu3 %v1101_v18 }
  0xe9   :  { %402 = vmatpush.msra.mxu0 %v1101_v18  ;;  %657 = vmatpush.msrb.mxu3 %v1101_v18 }
  0xeb   :  { %403 = vmatpush.msra.mxu0 %v1101_v18  ;;  %658 = vmatpush.msrb.mxu3 %v1101_v18 }
  0xed   :  { %404 = vmatpush.msra.mxu0 %v1101_v18  ;;  %659 = vmatpush.msrb.mxu3 %v1101_v18 }
  0xef   :  { %405 = vmatpush.msra.mxu0 %v1101_v18  ;;  %660 = vmatpush.msrb.mxu3 %v1101_v18 }
  0xf1   :  { %406 = vmatpush.msra.mxu0 %v1101_v18  ;;  %661 = vmatpush.msrb.mxu3 %v1101_v18 }
  0xf3   :  { %662 = vmatpush.msrb.mxu3 %v1101_v18 }
  0xf5   :  { %663 = vmatpush.msrb.mxu3 %v1101_v18 }
  0xf7   :  { %664 = vmatpush.msrb.mxu3 %v1101_v18 }
  0xf9   :  { %665 = vmatpush.msrb.mxu3 %v1101_v18 }
 0x10c   :  { %v158_v50 = vpop.f32.mrf.mxu1 }
 0x10d   :  { %949 = vlog2.f32 %v158_v50 }
 0x111   :  { %v228_v51 = vpop.f32.mrf.mxu3 }
 0x112   :  { %951 = vlog2.f32 %v228_v51 }
 0x113   :  { %v950_v52 = vpop.eup %949 }
 0x114   :  { %v162_v53 = vmul.f32 0.6931472, %v950_v52 }
 0x116   :  { %165 = vperm.xlu2 %933, %v162_v53  }
 0x118   :  { %v952_v54 = vpop.eup %951 }
 0x119   :  { %v232_v55 = vmul.f32 0.6931472, %v952_v54 }
 0x11b   :  { %235 = vperm.xlu1 %934, %v232_v55  }
 0x145   :  { %534 = vmax.xlane.f32.xlu1 %v1381_v62 }
 0x14d   :  { %645 = vmax.xlane.f32.xlu1 %v1387_v2 }
 0x14f   :  { %v113_v56 = vpop.f32.mrf.mxu0 }
 0x150   :  { %953 = vrcp.f32 %v113_v56 }
 0x155   :  { %682 = vmax.xlane.f32.xlu1 %v1400_v12 }
 0x156   :  { %v954_v57 = vpop.eup %953 }
 0x157   :  { %123 = vperm.xlu2 %933, %v954_v57   ;;  %v116_v58 = vpop.f32.mrf.mxu0 }
 0x158   :  { %955 = vrcp.f32 %v116_v58 }
 0x15d   :  { %v371_v26 = vpop.f32.mrf.mxu3  ;;  %830 = vmax.xlane.f32.xlu1 %v1417_v28 }
 0x15e   :  { %v956_v59 = vpop.eup %955  ;;  %957 = vlog2.f32 %v371_v26 }
 0x15f   :  { %128 = vperm.xlu0 %935, %v956_v59   ;;  %959 = vpow2.f32 %v315_v39 }
 0x164   :  { %v958_v31 = vpop.eup %957 }
 0x165   :  { %v375_v32 = vmul.f32 0.6931472, %v958_v31  ;;  %v960_v41 = vpop.eup %959 }
 0x170   :  { %v166_v13 = vpop.permute.xlu2 %165 }
 0x171   :  { %v168_v19 = vsub.f32 %v1298_v30, %v166_v13 }
 0x180   :  { %460 = vmax.xlane.f32.xlu2 %v1383_v63 }
 0x188   :  { %386 = vmax.xlane.f32.xlu2 %v1389_v4 }
 0x189   :  { %275 = vmax.xlane.f32.xlu0 %v1392_v5 }
 0x18d   :  { %v236_v16 = vpop.permute.xlu1 %235 }
 0x18e   :  { %v238_v20 = vsub.f32 %v1295_v29, %v236_v16  ;;  %v569_v29 = vld [vmem:[#allocation3 + $0x50] sm:$0xff] }
 0x18f   :  { %v1421_v30 = vmul.f32 10.0, %v569_v29 }
 0x190   :  { %497 = vmax.xlane.f32.xlu2 %v1396_v9  ;;  %v1411_v23 = vadd.f32 %v238_v20, %v168_v19 }
 0x191   :  { %756 = vmax.xlane.f32.xlu0 %v1398_v10 }
 0x198   :  { %423 = vmax.xlane.f32.xlu2 %v1407_v21 }
 0x199   :  { %719 = vmax.xlane.f32.xlu0 %v1409_v22 }
 0x1a0   :  { %608 = vmax.xlane.f32.xlu2 %v1415_v25 }
 0x1a8   :  { %571 = vmax.xlane.f32.xlu2 %v1421_v30 }
 0x1ad   :  { %378 = vperm.xlu0 %935, %v375_v32  }
 0x1b0   :  { %793 = vmax.xlane.f32.xlu2 %v1424_v34 }
 0x1b1   :  { %v124_v37 = vpop.permute.xlu2 %123 }
 0x1b2   :  { %v131_v38 = vmul.f32 %v1339_v43, %v124_v37 }
 0x1b4   :  { %v170_v40 = vmul.f32 %v168_v19, %v131_v38 }
 0x1b6   :  { %187 = vmatmul.f32.vlgmr.msra.gmra.mxu2 %v170_v40 }
 0x1b7   :  { %465 = vmatpush.msra.mxu2 %v1101_v18 }
 0x1b8   :  { %v535_v50 = vpop.xlane.xlu1 %534 }
 0x1b9   :  { %466 = vmatpush.msra.mxu2 %v1101_v18  ;;  %v1496_v57 = vsub.f32 %v1381_v62, %v535_v50 }
 0x1bb   :  { %467 = vmatpush.msra.mxu2 %v1101_v18  ;;  %v537_v59 = vmul.f32 1.442695, %v1496_v57 }
 0x1bd   :  { %468 = vmatpush.msra.mxu2 %v1101_v18 }
 0x1be   :  { %333 = vmatmul.f32.vlgmr.msrb.gmra.mxu2 %v960_v41 }
 0x1bf   :  { %469 = vmatpush.msra.mxu2 %v1101_v18 }
 0x1c0   :  { %v646_v61 = vpop.xlane.xlu1 %645 }
 0x1c1   :  { %470 = vmatpush.msra.mxu2 %v1101_v18  ;;  %v1507_v62 = vsub.f32 %v1387_v2, %v646_v61 }
 0x1c3   :  { %471 = vmatpush.msra.mxu2 %v1101_v18  ;;  %v648_v3 = vmul.f32 1.442695, %v1507_v62 }
 0x1c5   :  { %472 = vmatpush.msra.mxu2 %v1101_v18 }
 0x1c7   :  { %473 = vmatpush.msra.mxu2 %v1101_v18 }
 0x1c8   :  { %v683_v15 = vpop.xlane.xlu1 %682 }
 0x1c9   :  { %474 = vmatpush.msra.mxu2 %v1101_v18  ;;  %v1548_v16 = vsub.f32 %v1400_v12, %v683_v15 }
 0x1cb   :  { %475 = vmatpush.msra.mxu2 %v1101_v18  ;;  %v685_v12 = vmul.f32 1.442695, %v1548_v16 }
 0x1cd   :  { %476 = vmatpush.msra.mxu2 %v1101_v18 }
 0x1cf   :  { %477 = vmatpush.msra.mxu2 %v1101_v18 }
 0x1d0   :  { %v831_v39 = vpop.xlane.xlu1 %830 }
 0x1d1   :  { %v129_v36 = vpop.permute.xlu0 %128  ;;  %478 = vmatpush.msra.mxu2 %v1101_v18 }
 0x1d2   :  { %v132_v42 = vmul.f32 %v1345_v44, %v129_v36  ;;  %v1617_v36 = vsub.f32 %v1417_v28, %v831_v39 }
 0x1d3   :  { %479 = vmatpush.msra.mxu2 %v1101_v18 }
 0x1d4   :  { %v1448_v43 = vadd.f32 %v132_v42, %v131_v38  ;;  %v240_v45 = vmul.f32 %v238_v20, %v132_v42 }
 0x1d5   :  { %480 = vmatpush.msra.mxu2 %v1101_v18 }
 0x1d6   :  { %257 = vmatmul.f32.vlgmr.msrb.gmra.mxu0 %v240_v45 }
 0x1d7   :  { %613 = vmatpush.msrb.mxu2 %v1101_v18  ;;  %539 = vmatpush.msrb.mxu0 %v1101_v18 }
 0x1d9   :  { %614 = vmatpush.msrb.mxu2 %v1101_v18  ;;  %540 = vmatpush.msrb.mxu0 %v1101_v18 }
 0x1db   :  { %615 = vmatpush.msrb.mxu2 %v1101_v18  ;;  %541 = vmatpush.msrb.mxu0 %v1101_v18 }
 0x1dd   :  { %616 = vmatpush.msrb.mxu2 %v1101_v18  ;;  %542 = vmatpush.msrb.mxu0 %v1101_v18 }
 0x1df   :  { %617 = vmatpush.msrb.mxu2 %v1101_v18  ;;  %543 = vmatpush.msrb.mxu0 %v1101_v18 }
 0x1e1   :  { %618 = vmatpush.msrb.mxu2 %v1101_v18  ;;  %544 = vmatpush.msrb.mxu0 %v1101_v18 }
 0x1e3   :  { %619 = vmatpush.msrb.mxu2 %v1101_v18  ;;  %545 = vmatpush.msrb.mxu0 %v1101_v18 }
 0x1e5   :  { %620 = vmatpush.msrb.mxu2 %v1101_v18  ;;  %546 = vmatpush.msrb.mxu0 %v1101_v18 }
 0x1e7   :  { %621 = vmatpush.msrb.mxu2 %v1101_v18  ;;  %547 = vmatpush.msrb.mxu0 %v1101_v18 }
 0x1e9   :  { %622 = vmatpush.msrb.mxu2 %v1101_v18  ;;  %548 = vmatpush.msrb.mxu0 %v1101_v18 }
 0x1eb   :  { %623 = vmatpush.msrb.mxu2 %v1101_v18  ;;  %549 = vmatpush.msrb.mxu0 %v1101_v18 }
 0x1ed   :  { %624 = vmatpush.msrb.mxu2 %v1101_v18  ;;  %550 = vmatpush.msrb.mxu0 %v1101_v18 }
 0x1ef   :  { %625 = vmatpush.msrb.mxu2 %v1101_v18  ;;  %551 = vmatpush.msrb.mxu0 %v1101_v18 }
 0x1f1   :  { %626 = vmatpush.msrb.mxu2 %v1101_v18  ;;  %552 = vmatpush.msrb.mxu0 %v1101_v18 }
 0x1f3   :  { %627 = vmatpush.msrb.mxu2 %v1101_v18  ;;  %v461_v44 = vpop.xlane.xlu2 %460  ;;  %553 = vmatpush.msrb.mxu0 %v1101_v18 }
 0x1f4   :  { %v1482_v47 = vsub.f32 %v1383_v63, %v461_v44 }
 0x1f5   :  { %628 = vmatpush.msrb.mxu2 %v1101_v18  ;;  %554 = vmatpush.msrb.mxu0 %v1101_v18 }
 0x1f6   :  { %v463_v48 = vmul.f32 1.442695, %v1482_v47 }
 0x1f8   :  { %961 = vpow2.f32 %v463_v48 }
 0x1fb   :  { %v387_v49 = vpop.xlane.xlu2 %386 }
 0x1fc   :  { %v1488_v51 = vsub.f32 %v1389_v4, %v387_v49  ;;  %v276_v52 = vpop.xlane.xlu0 %275 }
 0x1fd   :  { %v1491_v53 = vsub.f32 %v1392_v5, %v276_v52 }
 0x1fe   :  { %v962_v54 = vpop.eup %961  ;;  %v389_v55 = vmul.f32 1.442695, %v1488_v51 }
 0x1ff   :  { %v278_v56 = vmul.f32 1.442695, %v1491_v53  ;;  %481 = vmatmul.f32.vlgmr.msra.gmra.mxu2 %v962_v54 }
 0x200   :  { %963 = vpow2.f32 %v389_v55  ;;  %761 = vmatpush.msra.mxu2 %v1101_v18 }
 0x201   :  { %965 = vpow2.f32 %v278_v56 }
 0x202   :  { %762 = vmatpush.msra.mxu2 %v1101_v18  ;;  %967 = vpow2.f32 %v537_v59 }
 0x203   :  { %v498_v58 = vpop.xlane.xlu2 %497 }
 0x204   :  { %v1502_v60 = vsub.f32 %v1396_v9, %v498_v58  ;;  %763 = vmatpush.msra.mxu2 %v1101_v18  ;;  %v757_v19 = vpop.xlane.xlu0 %756 }
 0x205   :  { %v1553_v20 = vsub.f32 %v1398_v10, %v757_v19 }
 0x206   :  { %v964_v63 = vpop.eup %963  ;;  %v500_v0 = vmul.f32 1.442695, %v1502_v60  ;;  %764 = vmatpush.msra.mxu2 %v1101_v18 }
 0x207   :  { %v966_v1 = vpop.eup %965  ;;  %407 = vmatmul.f32.vlgmr.msra.gmra.mxu0 %v964_v63  ;;  %v759_v26 = vmul.f32 1.442695, %v1553_v20 }
 0x208   :  { %969 = vpow2.f32 %v500_v0  ;;  %296 = vmatmul.f32.vlgmr.msrb.gmra.mxu1 %v966_v1  ;;  %687 = vmatpush.msra.mxu0 %v1101_v18  ;;  %v968_v5 = vpop.eup %967 }
 0x209   :  { %576 = vmatpush.msrb.mxu1 %v1101_v18  ;;  %765 = vmatpush.msra.mxu2 %v1101_v18  ;;  %971 = vpow2.f32 %v648_v3 }
 0x20a   :  { %688 = vmatpush.msra.mxu0 %v1101_v18 }
 0x20b   :  { %577 = vmatpush.msrb.mxu1 %v1101_v18  ;;  %v424_v2 = vpop.xlane.xlu2 %423  ;;  %766 = vmatpush.msra.mxu2 %v1101_v18 }
 0x20c   :  { %v1518_v4 = vsub.f32 %v1407_v21, %v424_v2  ;;  %689 = vmatpush.msra.mxu0 %v1101_v18  ;;  %v720_v37 = vpop.xlane.xlu0 %719 }
 0x20d   :  { %578 = vmatpush.msrb.mxu1 %v1101_v18  ;;  %767 = vmatpush.msra.mxu2 %v1101_v18  ;;  %v1609_v38 = vsub.f32 %v1409_v22, %v720_v37  ;;  %v833_v22 = vmul.f32 1.442695, %v1617_v36 }
 0x20e   :  { %v970_v6 = vpop.eup %969  ;;  %v426_v7 = vmul.f32 1.442695, %v1518_v4  ;;  %690 = vmatpush.msra.mxu0 %v1101_v18 }
 0x20f   :  { %579 = vmatpush.msrb.mxu1 %v1101_v18  ;;  %518 = vmatmul.f32.vlgmr.msra.gmra.mxu3 %v970_v6  ;;  %v972_v9 = vpop.eup %971  ;;  %v722_v42 = vmul.f32 1.442695, %v1609_v38 }
 0x210   :  { %973 = vpow2.f32 %v426_v7  ;;  %798 = vmatpush.msra.mxu3 %v1101_v18  ;;  %691 = vmatpush.msra.mxu0 %v1101_v18 }
 0x211   :  { %580 = vmatpush.msrb.mxu1 %v1101_v18  ;;  %555 = vmatmul.f32.vlgmr.msrb.gmra.mxu0 %v968_v5 }
 0x212   :  { %799 = vmatpush.msra.mxu3 %v1101_v18  ;;  %692 = vmatpush.msra.mxu0 %v1101_v18 }
 0x213   :  { %581 = vmatpush.msrb.mxu1 %v1101_v18  ;;  %v609_v8 = vpop.xlane.xlu2 %608  ;;  %768 = vmatpush.msra.mxu2 %v1101_v18 }
 0x214   :  { %v1534_v11 = vsub.f32 %v1415_v25, %v609_v8  ;;  %800 = vmatpush.msra.mxu3 %v1101_v18  ;;  %693 = vmatpush.msra.mxu0 %v1101_v18 }
 0x215   :  { %582 = vmatpush.msrb.mxu1 %v1101_v18  ;;  %769 = vmatpush.msra.mxu2 %v1101_v18 }
 0x216   :  { %v974_v13 = vpop.eup %973  ;;  %v611_v14 = vmul.f32 1.442695, %v1534_v11  ;;  %801 = vmatpush.msra.mxu3 %v1101_v18  ;;  %694 = vmatpush.msra.mxu0 %v1101_v18 }
 0x217   :  { %583 = vmatpush.msrb.mxu1 %v1101_v18  ;;  %666 = vmatmul.f32.vlgmr.msrb.gmra.mxu3 %v972_v9 }
 0x218   :  { %975 = vpow2.f32 %v611_v14  ;;  %444 = vmatmul.f32.vlgmr.msra.gmra.mxu1 %v974_v13  ;;  %802 = vmatpush.msra.mxu3 %v1101_v18 }
 0x219   :  { %584 = vmatpush.msrb.mxu1 %v1101_v18  ;;  %695 = vmatpush.msra.mxu0 %v1101_v18 }
 0x21a   :  { %803 = vmatpush.msra.mxu3 %v1101_v18  ;;  %770 = vmatpush.msra.mxu2 %v1101_v18 }
 0x21b   :  { %585 = vmatpush.msrb.mxu1 %v1101_v18  ;;  %v572_v21 = vpop.xlane.xlu2 %571  ;;  %696 = vmatpush.msra.mxu0 %v1101_v18 }
 0x21c   :  { %v1558_v24 = vsub.f32 %v1421_v30, %v572_v21  ;;  %804 = vmatpush.msra.mxu3 %v1101_v18  ;;  %771 = vmatpush.msra.mxu2 %v1101_v18 }
 0x21d   :  { %586 = vmatpush.msrb.mxu1 %v1101_v18  ;;  %697 = vmatpush.msra.mxu0 %v1101_v18 }
 0x21e   :  { %v976_v10 = vpop.eup %975  ;;  %v574_v25 = vmul.f32 1.442695, %v1558_v24  ;;  %805 = vmatpush.msra.mxu3 %v1101_v18  ;;  %772 = vmatpush.msra.mxu2 %v1101_v18 }
 0x21f   :  { %587 = vmatpush.msrb.mxu1 %v1101_v18  ;;  %629 = vmatmul.f32.vlgmr.msrb.gmra.mxu2 %v976_v10 }
 0x220   :  { %977 = vpow2.f32 %v574_v25  ;;  %806 = vmatpush.msra.mxu3 %v1101_v18  ;;  %698 = vmatpush.msra.mxu0 %v1101_v18 }
 0x221   :  { %588 = vmatpush.msrb.mxu1 %v1101_v18  ;;  %979 = vpow2.f32 %v685_v12  ;;  %773 = vmatpush.msra.mxu2 %v1101_v18 }
 0x222   :  { %807 = vmatpush.msra.mxu3 %v1101_v18  ;;  %699 = vmatpush.msra.mxu0 %v1101_v18  ;;  %981 = vpow2.f32 %v759_v26 }
 0x223   :  { %589 = vmatpush.msrb.mxu1 %v1101_v18  ;;  %v794_v27 = vpop.xlane.xlu2 %793  ;;  %774 = vmatpush.msra.mxu2 %v1101_v18 }
 0x224   :  { %v1579_v29 = vsub.f32 %v1424_v34, %v794_v27  ;;  %808 = vmatpush.msra.mxu3 %v1101_v18  ;;  %700 = vmatpush.msra.mxu0 %v1101_v18 }
 0x225   :  { %590 = vmatpush.msrb.mxu1 %v1101_v18  ;;  %775 = vmatpush.msra.mxu2 %v1101_v18 }
 0x226   :  { %v978_v30 = vpop.eup %977  ;;  %v796_v31 = vmul.f32 1.442695, %v1579_v29  ;;  %809 = vmatpush.msra.mxu3 %v1101_v18  ;;  %701 = vmatpush.msra.mxu0 %v1101_v18 }
 0x227   :  { %v980_v32 = vpop.eup %979  ;;  %591 = vmatpush.msrb.mxu1 %v1101_v18  ;;  %776 = vmatpush.msra.mxu2 %v1101_v18 }
 0x228   :  { %983 = vpow2.f32 %v796_v31  ;;  %592 = vmatmul.f32.vlgmr.msrb.gmra.mxu1 %v978_v30  ;;  %810 = vmatpush.msra.mxu3 %v1101_v18  ;;  %v982_v33 = vpop.eup %981 }
 0x229   :  { %724 = vmatpush.msra.mxu1 %v1101_v18  ;;  %702 = vmatpush.msra.mxu0 %v1101_v18  ;;  %985 = vpow2.f32 %v722_v42 }
 0x22a   :  { %811 = vmatpush.msra.mxu3 %v1101_v18  ;;  %703 = vmatmul.f32.vlgmr.msra.gmra.mxu0 %v980_v32  ;;  %987 = vpow2.f32 %v833_v22 }
 0x22b   :  { %725 = vmatpush.msra.mxu1 %v1101_v18  ;;  %835 = vmatpush.msrb.mxu0 %v1101_v18 }
 0x22c   :  { %812 = vmatpush.msra.mxu3 %v1101_v18  ;;  %777 = vmatmul.f32.vlgmr.msra.gmra.mxu2 %v982_v33 }
 0x22d   :  { %726 = vmatpush.msra.mxu1 %v1101_v18  ;;  %836 = vmatpush.msrb.mxu0 %v1101_v18 }
 0x22e   :  { %v984_v34 = vpop.eup %983  ;;  %813 = vmatpush.msra.mxu3 %v1101_v18 }
 0x22f   :  { %727 = vmatpush.msra.mxu1 %v1101_v18  ;;  %814 = vmatmul.f32.vlgmr.msra.gmra.mxu3 %v984_v34  ;;  %v986_v28 = vpop.eup %985 }
 0x230   :  { %837 = vmatpush.msrb.mxu0 %v1101_v18  ;;  %v988_v44 = vpop.eup %987 }
 0x231   :  { %728 = vmatpush.msra.mxu1 %v1101_v18 }
 0x232   :  { %838 = vmatpush.msrb.mxu0 %v1101_v18 }
 0x233   :  { %729 = vmatpush.msra.mxu1 %v1101_v18 }
 0x234   :  { %839 = vmatpush.msrb.mxu0 %v1101_v18 }
 0x235   :  { %730 = vmatpush.msra.mxu1 %v1101_v18 }
 0x236   :  { %840 = vmatpush.msrb.mxu0 %v1101_v18 }
 0x237   :  { %731 = vmatpush.msra.mxu1 %v1101_v18 }
 0x238   :  { %841 = vmatpush.msrb.mxu0 %v1101_v18 }
 0x239   :  { %732 = vmatpush.msra.mxu1 %v1101_v18  ;;  %v188_v40 = vpop.f32.mrf.mxu2 }
 0x23a   :  { %v192_v41 = vsel %vm191_vm4, %v188_v40, 0.0  ;;  %842 = vmatpush.msrb.mxu0 %v1101_v18 }
 0x23b   :  { %733 = vmatpush.msra.mxu1 %v1101_v18  ;;  %193 = vadd.xlane.f32.xlu2 %v192_v41 }
 0x23c   :  { %843 = vmatpush.msrb.mxu0 %v1101_v18 }
 0x23d   :  { %734 = vmatpush.msra.mxu1 %v1101_v18 }
 0x23e   :  { %844 = vmatpush.msrb.mxu0 %v1101_v18 }
 0x23f   :  { %735 = vmatpush.msra.mxu1 %v1101_v18 }
 0x240   :  { %845 = vmatpush.msrb.mxu0 %v1101_v18 }
 0x241   :  { %736 = vmatpush.msra.mxu1 %v1101_v18  ;;  %v334_v45 = vpop.f32.mrf.mxu2 }
 0x242   :  { %846 = vmatpush.msrb.mxu0 %v1101_v18  ;;  %989 = vlog2.f32 %v334_v45 }
 0x243   :  { %737 = vmatpush.msra.mxu1 %v1101_v18 }
 0x244   :  { %847 = vmatpush.msrb.mxu0 %v1101_v18 }
 0x245   :  { %738 = vmatpush.msra.mxu1 %v1101_v18 }
 0x246   :  { %848 = vmatpush.msrb.mxu0 %v1101_v18 }
 0x247   :  { %739 = vmatpush.msra.mxu1 %v1101_v18 }
 0x248   :  { %740 = vmatmul.f32.vlgmr.msra.gmra.mxu1 %v986_v28  ;;  %849 = vmatpush.msrb.mxu0 %v1101_v18  ;;  %v990_v48 = vpop.eup %989 }
 0x249   :  { %865 = vmatpush.msrb.mxu1 %v1101_v18  ;;  %v338_v49 = vmul.f32 0.6931472, %v990_v48 }
 0x24a   :  { %850 = vmatpush.msrb.mxu0 %v1101_v18 }
 0x24b   :  { %851 = vmatmul.f32.vlgmr.msrb.gmra.mxu0 %v988_v44  ;;  %866 = vmatpush.msrb.mxu1 %v1101_v18 }
 0x24d   :  { %867 = vmatpush.msrb.mxu1 %v1101_v18 }
 0x24f   :  { %868 = vmatpush.msrb.mxu1 %v1101_v18 }
 0x251   :  { %869 = vmatpush.msrb.mxu1 %v1101_v18 }
 0x253   :  { %341 = vperm.xlu2 %933, %v338_v49   ;;  %870 = vmatpush.msrb.mxu1 %v1101_v18  ;;  %v258_v58 = vpop.f32.mrf.mxu0 }
 0x254   :  { %v261_v42 = vsel %vm191_vm4, %v258_v58, 0.0 }
 0x255   :  { %871 = vmatpush.msrb.mxu1 %v1101_v18 }
 0x257   :  { %872 = vmatpush.msrb.mxu1 %v1101_v18 }
 0x259   :  { %873 = vmatpush.msrb.mxu1 %v1101_v18 }
 0x25b   :  { %874 = vmatpush.msrb.mxu1 %v1101_v18 }
 0x25d   :  { %875 = vmatpush.msrb.mxu1 %v1101_v18 }
 0x25f   :  { %876 = vmatpush.msrb.mxu1 %v1101_v18 }
 0x261   :  { %877 = vmatpush.msrb.mxu1 %v1101_v18 }
 0x263   :  { %878 = vmatpush.msrb.mxu1 %v1101_v18 }
 0x265   :  { %879 = vmatpush.msrb.mxu1 %v1101_v18 }
 0x267   :  { %880 = vmatpush.msrb.mxu1 %v1101_v18 }
 0x282   :  { %v482_v50 = vpop.f32.mrf.mxu2 }
 0x283   :  { %991 = vlog2.f32 %v482_v50 }
 0x284   :  { %v408_v63 = vpop.f32.mrf.mxu0 }
 0x285   :  { %v297_v52 = vpop.f32.mrf.mxu1 }
 0x286   :  { %993 = vlog2.f32 %v297_v52 }
 0x289   :  { %v992_v54 = vpop.eup %991 }
 0x28a   :  { %v486_v55 = vmul.f32 0.6931472, %v992_v54 }
 0x28c   :  { %v994_v56 = vpop.eup %993  ;;  %489 = vperm.xlu2 %933, %v486_v55  }
 0x28d   :  { %v301_v59 = vmul.f32 0.6931472, %v994_v56 }
 0x28e   :  { %v556_v5 = vpop.f32.mrf.mxu0 }
 0x28f   :  { %304 = vperm.xlu1 %934, %v301_v59  }
 0x292   :  { %v519_v61 = vpop.f32.mrf.mxu3 }
 0x293   :  { %995 = vlog2.f32 %v519_v61  ;;  %v379_v61 = vpop.permute.xlu0 %378 }
 0x295   :  { %v445_v0 = vpop.f32.mrf.mxu1 }
 0x296   :  { %997 = vlog2.f32 %v445_v0 }
 0x297   :  { %999 = vlog2.f32 %v408_v63 }
 0x299   :  { %v996_v1 = vpop.eup %995 }
 0x29a   :  { %v523_v3 = vmul.f32 0.6931472, %v996_v1  ;;  %v667_v14 = vpop.f32.mrf.mxu3 }
 0x29c   :  { %v998_v18 = vpop.eup %997  ;;  %526 = vperm.xlu1 %934, %v523_v3  }
 0x29d   :  { %v449_v2 = vmul.f32 0.6931472, %v998_v18  ;;  %v1000_v6 = vpop.eup %999 }
 0x29e   :  { %v412_v7 = vmul.f32 0.6931472, %v1000_v6 }
 0x29f   :  { %452 = vperm.xlu0 %935, %v449_v2  }
 0x2a2   :  { %v630_v8 = vpop.f32.mrf.mxu2 }
 0x2a3   :  { %1001 = vlog2.f32 %v630_v8 }
 0x2a4   :  { %415 = vperm.xlu1 %934, %v412_v7  }
 0x2a5   :  { %v593_v9 = vpop.f32.mrf.mxu1 }
 0x2a6   :  { %1003 = vlog2.f32 %v593_v9 }
 0x2a7   :  { %v704_v13 = vpop.f32.mrf.mxu0 }
 0x2a8   :  { %1005 = vlog2.f32 %v704_v13  ;;  %v381_v13 = vsub.f32 %v1362_v46, %v379_v61 }
 0x2a9   :  { %v1002_v15 = vpop.eup %1001 }
 0x2aa   :  { %v634_v19 = vmul.f32 0.6931472, %v1002_v15 }
 0x2ac   :  { %v1004_v21 = vpop.eup %1003  ;;  %637 = vperm.xlu1 %934, %v634_v19  }
 0x2ad   :  { %v597_v12 = vmul.f32 0.6931472, %v1004_v21 }
 0x2ae   :  { %v194_v10 = vpop.xlane.xlu2 %193  ;;  %v1006_v26 = vpop.eup %1005 }
 0x2af   :  { %v195_v25 = vrot.slane %v194_v10, 4  ;;  %600 = vperm.xlu2 %933, %v597_v12   ;;  %v708_v31 = vmul.f32 0.6931472, %v1006_v26  ;;  %v778_v54 = vpop.f32.mrf.mxu2 }
 0x2b1   :  { %v196_v27 = vadd.f32 %v195_v25, %v194_v10 }
 0x2b2   :  { %v815_v30 = vpop.f32.mrf.mxu3 }
 0x2b3   :  { %v197_v32 = vrot.slane %v196_v27, 2  ;;  %1007 = vlog2.f32 %v815_v30 }
 0x2b5   :  { %v198_v33 = vadd.f32 %v197_v32, %v196_v27 }
 0x2b6   :  { %v342_v3 = vpop.permute.xlu2 %341 }
 0x2b7   :  { %711 = vperm.xlu2 %933, %v708_v31   ;;  %v199_v34 = vrot.slane %v198_v33, 1  ;;  %v344_v2 = vsub.f32 %v1427_v35, %v342_v3 }
 0x2b9   :  { %v1008_v37 = vpop.eup %1007  ;;  %v200_v39 = vadd.f32 %v199_v34, %v198_v33 }
 0x2ba   :  { %v819_v40 = vmul.f32 0.6931472, %v1008_v37 }
 0x2bb   :  { %920 = vpush %v200_v39 }
 0x2bf   :  { %822 = vperm.xlu2 %933, %v819_v40  }
 0x2c5   :  { %v741_v41 = vpop.f32.mrf.mxu1 }
 0x2c6   :  { %1009 = vlog2.f32 %v741_v41 }
 0x2c8   :  { %v852_v22 = vpop.f32.mrf.mxu0 }
 0x2c9   :  { %262 = vadd.xlane.f32.xlu0 %v261_v42  ;;  %1011 = vlog2.f32 %v852_v22 }
 0x2ca   :  { %1013 = vlog2.f32 %v556_v5 }
 0x2cb   :  { %1015 = vlog2.f32 %v667_v14 }
 0x2cc   :  { %v1010_v28 = vpop.eup %1009  ;;  %1017 = vlog2.f32 %v778_v54 }
 0x2cd   :  { %v745_v45 = vmul.f32 0.6931472, %v1010_v28 }
 0x2cf   :  { %748 = vperm.xlu1 %934, %v745_v45   ;;  %v1012_v44 = vpop.eup %1011 }
 0x2d0   :  { %v856_v48 = vmul.f32 0.6931472, %v1012_v44  ;;  %v1014_v49 = vpop.eup %1013 }
 0x2d1   :  { %v560_v50 = vmul.f32 0.6931472, %v1014_v49  ;;  %v1016_v52 = vpop.eup %1015 }
 0x2d2   :  { %v671_v55 = vmul.f32 0.6931472, %v1016_v52  ;;  %v1018_v56 = vpop.eup %1017 }
 0x2d3   :  { %v782_v58 = vmul.f32 0.6931472, %v1018_v56 }
 0x2d7   :  { %859 = vperm.xlu1 %934, %v856_v48  }
 0x2dd   :  { %563 = vperm.xlu0 %935, %v560_v50  }
 0x2e5   :  { %674 = vperm.xlu0 %935, %v671_v55  }
 0x2e6   :  { %v490_v21 = vpop.permute.xlu2 %489 }
 0x2e7   :  { %v492_v35 = vsub.f32 %v1482_v47, %v490_v21 }
 0x2ec   :  { %s921_s28 = spop %920 }
 0x2ed   :  { %785 = vperm.xlu0 %935, %v782_v58  }
 0x301   :  { %v305_v59 = vpop.permute.xlu1 %304 }
 0x302   :  { %v307_v1 = vsub.f32 %v1491_v53, %v305_v59 }
 0x304   :  { %v308_v18 = vadd.f32 %v307_v1, %v1411_v23 }
 0x306   :  { %v345_v8 = vadd.f32 %v344_v2, %v308_v18 }
 0x308   :  { %v382_v19 = vadd.f32 %v381_v13, %v345_v8 }
 0x309   :  { %v601_v27 = vpop.permute.xlu2 %600 }
 0x30a   :  { %v603_v34 = vsub.f32 %v1558_v24, %v601_v27 }
 0x30e   :  { %v527_v63 = vpop.permute.xlu1 %526 }
 0x30f   :  { %v529_v31 = vsub.f32 %v1502_v60, %v527_v63 }
 0x311   :  { %v453_v0 = vpop.permute.xlu0 %452  ;;  %v712_v40 = vpop.permute.xlu2 %711 }
 0x312   :  { %v455_v25 = vsub.f32 %v1518_v4, %v453_v0  ;;  %v714_v28 = vsub.f32 %v1548_v16, %v712_v40 }
 0x316   :  { %v416_v6 = vpop.permute.xlu1 %415 }
 0x317   :  { %v418_v14 = vsub.f32 %v1488_v51, %v416_v6 }
 0x319   :  { %v419_v10 = vadd.f32 %v418_v14, %v382_v19  ;;  %v823_v48 = vpop.permute.xlu2 %822 }
 0x31a   :  { %v825_v52 = vsub.f32 %v1579_v29, %v823_v48  ;;  %v72_v29 = vrot.slane %v1150_v17, 4 }
 0x31b   :  { %v456_v26 = vadd.f32 %v455_v25, %v419_v10 }
 0x31d   :  { %v493_v30 = vadd.f32 %v492_v35, %v456_v26 }
 0x31e   :  { %v638_v46 = vpop.permute.xlu1 %637 }
 0x31f   :  { %v530_v51 = vadd.f32 %v529_v31, %v493_v30  ;;  %v640_v4 = vsub.f32 %v1534_v11, %v638_v46 }
 0x33c   :  { %v263_v5 = vpop.xlane.xlu0 %262 }
 0x33d   :  { %v264_v7 = vrot.slane %v263_v5, 4 }
 0x33f   :  { %v265_v9 = vadd.f32 %v264_v7, %v263_v5 }
 0x341   :  { %v266_v15 = vrot.slane %v265_v9, 2  ;;  %v749_v41 = vpop.permute.xlu1 %748 }
 0x342   :  { %v751_v44 = vsub.f32 %v1609_v38, %v749_v41 }
 0x343   :  { %v267_v12 = vadd.f32 %v266_v15, %v265_v9 }
 0x345   :  { %v268_v53 = vrot.slane %v267_v12, 1 }
 0x347   :  { %v269_v23 = vadd.f32 %v268_v53, %v267_v12 }
 0x349   :  { %922 = vpush %v269_v23  ;;  %v860_v50 = vpop.permute.xlu1 %859 }
 0x34a   :  { %v862_v54 = vsub.f32 %v1617_v36, %v860_v50  ;;  %v73_v36 = vadd.f32 %v72_v29, %v1150_v17 }
 0x34c   :  { %v74_v3 = vrot.slane %v73_v36, 2 }
 0x34e   :  { %v75_v18 = vadd.f32 %v74_v3, %v73_v36 }
 0x34f   :  { %v564_v32 = vpop.permute.xlu0 %563 }
 0x350   :  { %v566_v33 = vsub.f32 %v1496_v57, %v564_v32 }
 0x352   :  { %v567_v37 = vadd.f32 %v566_v33, %v530_v51 }
 0x354   :  { %v604_v39 = vadd.f32 %v603_v34, %v567_v37 }
 0x356   :  { %v641_v22 = vadd.f32 %v640_v4, %v604_v39 }
 0x357   :  { %v675_v42 = vpop.permute.xlu0 %674 }
 0x358   :  { %v677_v47 = vsub.f32 %v1507_v62, %v675_v42 }
 0x35a   :  { %v678_v60 = vadd.f32 %v677_v47, %v641_v22 }
 0x35c   :  { %v715_v45 = vadd.f32 %v714_v28, %v678_v60 }
 0x35e   :  { %v752_v49 = vadd.f32 %v751_v44, %v715_v45 }
 0x35f   :  { %v786_v57 = vpop.permute.xlu0 %785 }
 0x360   :  { %v788_v24 = vsub.f32 %v1553_v20, %v786_v57 }
 0x362   :  { %v789_v11 = vadd.f32 %v788_v24, %v752_v49 }
 0x364   :  { %v826_v55 = vadd.f32 %v825_v52, %v789_v11 }
 0x366   :  { %v863_v56 = vadd.f32 %v862_v54, %v826_v55 }
 0x368   :  { %v864_v62 = vmul.f32 %v863_v56, %v1448_v43  ;;  %v76_v43 = vrot.slane %v75_v18, 1 }
 0x36a   :  { %881 = vmatmul.f32.vlgmr.msrb.gmra.mxu1 %v864_v62  ;;  %v77_v2 = vadd.f32 %v76_v43, %v75_v18 }
 0x37a   :  { %s923_s29 = spop %922 }
 0x37b   :  { %s271_s30 = sadd.f32 %s923_s29, %s921_s28 }
 0x3e7   :  { %v882_v16 = vpop.f32.mrf.mxu1 }
 0x3e8   :  { %v885_v58 = vsel %vm191_vm4, %v882_v16, 0.0 }
 0x3e9   :  { %886 = vadd.xlane.f32.xlu0 %v885_v58 }
 0x45c   :  { %v887_v38 = vpop.xlane.xlu0 %886 }
 0x45d   :  { %v888_v59 = vrot.slane %v887_v38, 4 }
 0x45f   :  { %v889_v61 = vadd.f32 %v888_v59, %v887_v38 }
 0x461   :  { %v890_v63 = vrot.slane %v889_v61, 2 }
 0x463   :  { %v891_v20 = vadd.f32 %v890_v63, %v889_v61 }
 0x465   :  { %v892_v0 = vrot.slane %v891_v20, 1 }
 0x467   :  { %v893_v1 = vadd.f32 %v892_v0, %v891_v20 }
 0x469   :  { %924 = vpush %v893_v1 }
 0x49a   :  { %s925_s7 = spop %924 }
 0x49b   :  { %s895_s11 = ssub.f32 %s271_s30, %s925_s7 }
 0x49d   :  { %v896_v5 = vstv %s895_s11 }
 0x49e   :  { %v898_v17 = vsel %vm897_vm5, %v77_v2, %v896_v5 }
 0x49f   :  { %899 = vst [vmem:[#allocation8] sm:$0x3] %v898_v17 }
 0x4a0   :  { %910 = dma.vmem_to_hbm [thread:$0]  %s906_s6, 32, %s908_s10, [#allocation5]  }
 0x4a1   :  { %1095 = dma.done.wait [#allocation5], 32  }
 0x4a2   :  { %1096 = vsyncadd [#allocation5], 4294967264 }
 0x4a3   :  { %915 = vsyncpa [#allocation4], 1 }
 0x4a4   :  { %916 = vsyncpa [#allocation7], 1 }
 0x4a5   :  { %917 = vsyncpa [#allocation5], 1 }

</bundles_post_ra>
